<compile_context>
chip_gen: v5e
topology: v5e:2x2
jax: 0.10.0
libtpu: 0.0.40
codegen_flags: <defaults>
</compile_context>

<pallas_src>
import functools

import jax
import jax.numpy as jnp
import numpy as np
from jax import lax
from jax.experimental import pallas as pl
from jax.experimental.pallas import tpu as pltpu

NEG_SLOPE = 0.01
K = 3  # 3x3 convs


def _leaky(x):
    return jnp.where(x >= 0, x, NEG_SLOPE * x)


# --------------------------- fused residual-block kernel ---------------------------
def _resblock_kernel(width,
                     x0_ref, x1_ref, mask_ref,
                     w0_ref, b0_ref, w1_ref, b1_ref,    # fused SFT weights (both layers)
                     cw_ref, cb_ref,                    # fused 3x3 conv weights (2, c, 9c) + bias
                     out_ref):
    x0 = x0_ref[...]                                    # (c, bhw)  f32, batch folded into lanes
    c, bhw = x0.shape

    def mm(wgt_bf16, act):
        # bf16 MXU operands, f32 accumulate; elementwise math stays f32.
        return jnp.dot(wgt_bf16, act.astype(jnp.bfloat16),
                       preferred_element_type=jnp.float32)

    # --- all four SFT scale/shift branches of BOTH layers (depend only on x1) ---
    hidden = _leaky(mm(w0_ref[...], x1_ref[...]) + b0_ref[...])   # (4c, bhw)
    ss = mm(w1_ref[...], hidden) + b1_ref[...]                    # (4c, bhw), block-diag W1
    scale0 = ss[0 * c:1 * c]
    shift0 = ss[1 * c:2 * c]
    scale1 = ss[2 * c:3 * c]
    shift1 = ss[3 * c:4 * c]

    # --- 3x3 conv (padding=1) as ONE matmul: (c, 9c) @ (9c, bhw) ---
    def conv3x3(layer, fea):
        taps = []
        for t in range(K * K):
            dy, dx = divmod(t, K)
            d = (dy - 1) * width + (dx - 1)              # flattened-spatial offset of tap t
            if d == 0:
                taps.append(fea)                         # center tap: no shift, all-valid
            else:
                taps.append(pltpu.roll(fea, shift=(-d) % bhw, axis=1) * mask_ref[t])
        stack = jnp.concatenate(taps, axis=0)            # (9c, bhw)
        return mm(cw_ref[layer], stack) + cb_ref[layer]

    fea = _leaky(x0 * scale0 + shift0)                   # sft0 + leaky
    fea = conv3x3(0, fea)                                # conv1
    fea = _leaky(fea * scale1 + shift1)                  # sft1 + leaky
    fea = conv3x3(1, fea)                                # conv2
    out_ref[...] = x0 + fea                              # residual add; lane-dense store


# ----------------------------------- wrapper ---------------------------------------
def residual_block_sft_forward(x0, x1, params):
    b, c, h, w = x0.shape
    _, r, _, _ = x1.shape
    hw = h * w
    bhw = b * hw

    # Fold batch into the lane axis: lane index = batch*hw + y*w + x.
    x0f = jnp.transpose(x0, (1, 0, 2, 3)).reshape(c, bhw)
    x1f = jnp.transpose(x1, (1, 0, 2, 3)).reshape(r, bhw).astype(jnp.bfloat16)

    # Per-tap validity masks implementing zero padding; tiled per image so the roll
    # never leaks across image (or batch-wrap) boundaries.  Shape (9, 1, bhw).
    yy = jnp.arange(h)[:, None]
    xx = jnp.arange(w)[None, :]
    mask_list = []
    for t in range(K * K):
        dy, dx = divmod(t, K)
        sy, sx = dy - 1, dx - 1
        valid = ((yy + sy >= 0) & (yy + sy < h) & (xx + sx >= 0) & (xx + sx < w))
        m = valid.astype(jnp.float32).reshape(1, hw)
        mask_list.append(jnp.tile(m, (1, b)))
    masks = jnp.stack(mask_list)                         # (9, 1, bhw)

    # Fuse the four SFT branches (scale/shift of both layers) into two weights.
    p0, p1 = params["sft0"], params["sft1"]
    w0 = jnp.concatenate([p0["ws0"], p0["wt0"], p1["ws0"], p1["wt0"]], axis=0)      # (4c, r)
    b0 = jnp.concatenate([p0["bs0"], p0["bt0"], p1["bs0"], p1["bt0"]]).reshape(4 * c, 1)

    def block_diag(mats):
        zero = jnp.zeros((c, c), jnp.float32)
        rows = []
        for i, m in enumerate(mats):
            rows.append(jnp.concatenate([m if j == i else zero for j in range(len(mats))],
                                        axis=1))
        return jnp.concatenate(rows, axis=0)

    w1 = block_diag([p0["ws1"], p0["wt1"], p1["ws1"], p1["wt1"]])                   # (4c, 4c)
    b1 = jnp.concatenate([p0["bs1"], p0["bt1"], p1["bs1"], p1["bt1"]]).reshape(4 * c, 1)

    # PyTorch conv weight (c_out, c_in, 3, 3) -> (c_out, 9*c_in); column = (ky*3+kx)*c + ci.
    def fuse_conv(wconv):
        return jnp.transpose(wconv, (0, 2, 3, 1)).reshape(c, K * K * c)

    cw = jnp.stack([fuse_conv(params["conv1_w"]), fuse_conv(params["conv2_w"])])    # (2, c, 9c)
    cb = jnp.stack([params["conv1_b"], params["conv2_b"]]).reshape(2, c, 1)

    # bf16 MXU operands (weights pre-cast once), biases stay f32.
    w0b = w0.astype(jnp.bfloat16)
    w1b = w1.astype(jnp.bfloat16)
    cwb = cw.astype(jnp.bfloat16)

    def cspec(shape):
        nd = len(shape)
        return pl.BlockSpec(shape, lambda i, _nd=nd: (0,) * _nd)

    operands = (x0f, x1f, masks, w0b, b0, w1b, b1, cwb, cb)

    out_f = pl.pallas_call(
        functools.partial(_resblock_kernel, w),
        grid=(1,),
        in_specs=[cspec(op.shape) for op in operands],
        out_specs=cspec((c, bhw)),
        out_shape=jax.ShapeDtypeStruct((c, bhw), jnp.float32),
        compiler_params=pltpu.CompilerParams(dimension_semantics=("arbitrary",)),
    )(*operands)

    out = jnp.transpose(out_f.reshape(c, b, h, w), (1, 0, 2, 3))
    return out, x1


# ------------------------- pure-JAX reference (mirrors PyTorch) ---------------------
def reference(x0, x1, params):
    def conv1x1(x, wgt, bias):
        return jnp.einsum("oi,bihw->bohw", wgt, x) + bias[None, :, None, None]

    def sft(fea, cond, p):
        scale = conv1x1(_leaky(conv1x1(cond, p["ws0"], p["bs0"])), p["ws1"], p["bs1"])
        shift = conv1x1(_leaky(conv1x1(cond, p["wt0"], p["bt0"])), p["wt1"], p["bt1"])
        return fea * scale + shift

    def conv3x3(x, wgt, bias):
        y = lax.conv_general_dilated(x, wgt, (1, 1), ((1, 1), (1, 1)),
                                     dimension_numbers=("NCHW", "OIHW", "NCHW"))
        return y + bias[None, :, None, None]

    fea = _leaky(sft(x0, x1, params["sft0"]))
    fea = conv3x3(fea, params["conv1_w"], params["conv1_b"])
    fea = _leaky(sft(fea, x1, params["sft1"]))
    fea = conv3x3(fea, params["conv2_w"], params["conv2_b"])
    return x0 + fea


if __name__ == "__main__":
    b, num_feat, rep_feat, h, w = 2, 4, 8, 16, 16

    kit = iter(jax.random.split(jax.random.PRNGKey(0), 32))

    def rand(shape, scale=0.1):
        return jax.random.normal(next(kit), shape, jnp.float32) * scale

    # x is a pair in the PyTorch module: x[0]=(b, num_feat, h, w), x[1]=(b, rep_feat, h, w)
    x0 = jax.random.normal(next(kit), (b, num_feat, h, w), jnp.float32)
    x1 = jax.random.normal(next(kit), (b, rep_feat, h, w), jnp.float32)

    def sft_params():
        return {
            "ws0": rand((num_feat, rep_feat)), "bs0": rand((num_feat,)),
            "ws1": rand((num_feat, num_feat)), "bs1": rand((num_feat,)),
            "wt0": rand((num_feat, rep_feat)), "bt0": rand((num_feat,)),
            "wt1": rand((num_feat, num_feat)), "bt1": rand((num_feat,)),
        }

    params = {
        "sft0": sft_params(),
        "sft1": sft_params(),
        "conv1_w": rand((num_feat, num_feat, K, K)), "conv1_b": rand((num_feat,)),
        "conv2_w": rand((num_feat, num_feat, K, K)), "conv2_b": rand((num_feat,)),
    }

    out0, out1 = jax.jit(residual_block_sft_forward)(x0, x1, params)
    out0 = jax.block_until_ready(out0)
    ref0 = jax.block_until_ready(reference(x0, x1, params))

    assert out0.shape == (b, num_feat, h, w)
    # bf16 MXU operands with f32 accumulation -> looser tolerance than the pure-f32 ref.
    np.testing.assert_allclose(np.asarray(out0), np.asarray(ref0), rtol=2e-2, atol=2e-2)
    np.testing.assert_allclose(np.asarray(out1), np.asarray(x1))
    print("KERNEL_OK")
</pallas_src>

<mosaic_0001>
module attributes {stable_mosaic.version = 11 : i64} {
  func.func @_resblock_kernel(%arg0: i32, %arg1: memref<4x512xf32, #tpu.memory_space<vmem>>, %arg2: memref<8x512xbf16, #tpu.memory_space<vmem>>, %arg3: memref<9x1x512xf32, #tpu.memory_space<vmem>>, %arg4: memref<16x8xbf16, #tpu.memory_space<vmem>>, %arg5: memref<16x1xf32, #tpu.memory_space<vmem>>, %arg6: memref<16x16xbf16, #tpu.memory_space<vmem>>, %arg7: memref<16x1xf32, #tpu.memory_space<vmem>>, %arg8: memref<2x4x36xbf16, #tpu.memory_space<vmem>>, %arg9: memref<2x4x1xf32, #tpu.memory_space<vmem>>, %arg10: memref<4x512xf32, #tpu.memory_space<vmem>>) attributes {dimension_semantics = [#tpu.dimension_semantics<arbitrary>], iteration_bounds = array<i64: 1>, scalar_prefetch = 0 : i64, scratch_operands = 0 : i64, tpu.core_type = #tpu.core_type<tc>, window_params = [{pipeline_mode = #tpu.pipeline_mode<synchronous>, transform_indices = @transform_0, window_bounds = array<i64: 4, 512>}, {pipeline_mode = #tpu.pipeline_mode<synchronous>, transform_indices = @transform_1, window_bounds = array<i64: 8, 512>}, {pipeline_mode = #tpu.pipeline_mode<synchronous>, transform_indices = @transform_2, window_bounds = array<i64: 9, 1, 512>}, {pipeline_mode = #tpu.pipeline_mode<synchronous>, transform_indices = @transform_3, window_bounds = array<i64: 16, 8>}, {pipeline_mode = #tpu.pipeline_mode<synchronous>, transform_indices = @transform_4, window_bounds = array<i64: 16, 1>}, {pipeline_mode = #tpu.pipeline_mode<synchronous>, transform_indices = @transform_5, window_bounds = array<i64: 16, 16>}, {pipeline_mode = #tpu.pipeline_mode<synchronous>, transform_indices = @transform_6, window_bounds = array<i64: 16, 1>}, {pipeline_mode = #tpu.pipeline_mode<synchronous>, transform_indices = @transform_7, window_bounds = array<i64: 2, 4, 36>}, {pipeline_mode = #tpu.pipeline_mode<synchronous>, transform_indices = @transform_8, window_bounds = array<i64: 2, 4, 1>}, {pipeline_mode = #tpu.pipeline_mode<synchronous>, transform_indices = @transform_9, window_bounds = array<i64: 4, 512>}]} {
    %c0 = arith.constant 0 : index
    %c0_0 = arith.constant 0 : index
    %0 = vector.load %arg1[%c0, %c0_0] : memref<4x512xf32, #tpu.memory_space<vmem>>, vector<4x512xf32>
    %c0_1 = arith.constant 0 : index
    %c0_2 = arith.constant 0 : index
    %1 = vector.load %arg4[%c0_1, %c0_2] : memref<16x8xbf16, #tpu.memory_space<vmem>>, vector<16x8xbf16>
    %c0_3 = arith.constant 0 : index
    %c0_4 = arith.constant 0 : index
    %2 = vector.load %arg2[%c0_3, %c0_4] : memref<8x512xbf16, #tpu.memory_space<vmem>>, vector<8x512xbf16>
    %cst = arith.constant dense<0.000000e+00> : vector<16x512xf32>
    %3 = tpu.matmul %1, %2, %cst {dimension_numbers = #tpu.dot_dimension_numbers<[1], [0], [0], [1], [0, 0, 1, 1], [], []>} : vector<16x8xbf16>, vector<8x512xbf16>, vector<16x512xf32> -> vector<16x512xf32>
    %c0_5 = arith.constant 0 : index
    %c0_6 = arith.constant 0 : index
    %4 = vector.load %arg5[%c0_5, %c0_6] : memref<16x1xf32, #tpu.memory_space<vmem>>, vector<16x1xf32>
    %5 = vector.broadcast %4 : vector<16x1xf32> to vector<16x512xf32>
    %6 = arith.addf %3, %5 : vector<16x512xf32>
    %cst_7 = arith.constant 0.000000e+00 : f32
    %7 = vector.broadcast %cst_7 : f32 to vector<16x512xf32>
    %8 = arith.cmpf oge, %6, %7 : vector<16x512xf32>
    %cst_8 = arith.constant 0.00999999977 : f32
    %9 = vector.broadcast %cst_8 : f32 to vector<16x512xf32>
    %10 = arith.mulf %9, %6 : vector<16x512xf32>
    %11 = arith.select %8, %6, %10 : vector<16x512xi1>, vector<16x512xf32>
    %c0_9 = arith.constant 0 : index
    %c0_10 = arith.constant 0 : index
    %12 = vector.load %arg6[%c0_9, %c0_10] : memref<16x16xbf16, #tpu.memory_space<vmem>>, vector<16x16xbf16>
    %13 = arith.truncf %11 : vector<16x512xf32> to vector<16x512xbf16>
    %cst_11 = arith.constant dense<0.000000e+00> : vector<16x512xf32>
    %14 = tpu.matmul %12, %13, %cst_11 {dimension_numbers = #tpu.dot_dimension_numbers<[1], [0], [0], [1], [0, 0, 1, 1], [], []>} : vector<16x16xbf16>, vector<16x512xbf16>, vector<16x512xf32> -> vector<16x512xf32>
    %c0_12 = arith.constant 0 : index
    %c0_13 = arith.constant 0 : index
    %15 = vector.load %arg7[%c0_12, %c0_13] : memref<16x1xf32, #tpu.memory_space<vmem>>, vector<16x1xf32>
    %16 = vector.broadcast %15 : vector<16x1xf32> to vector<16x512xf32>
    %17 = arith.addf %14, %16 : vector<16x512xf32>
    %18 = vector.extract_strided_slice %17 {offsets = [0, 0], sizes = [4, 512], strides = [1, 1]} : vector<16x512xf32> to vector<4x512xf32>
    %19 = vector.extract_strided_slice %17 {offsets = [4, 0], sizes = [4, 512], strides = [1, 1]} : vector<16x512xf32> to vector<4x512xf32>
    %20 = vector.extract_strided_slice %17 {offsets = [8, 0], sizes = [4, 512], strides = [1, 1]} : vector<16x512xf32> to vector<4x512xf32>
    %21 = vector.extract_strided_slice %17 {offsets = [12, 0], sizes = [4, 512], strides = [1, 1]} : vector<16x512xf32> to vector<4x512xf32>
    %22 = arith.mulf %0, %18 : vector<4x512xf32>
    %23 = arith.addf %22, %19 : vector<4x512xf32>
    %cst_14 = arith.constant 0.000000e+00 : f32
    %24 = vector.broadcast %cst_14 : f32 to vector<4x512xf32>
    %25 = arith.cmpf oge, %23, %24 : vector<4x512xf32>
    %cst_15 = arith.constant 0.00999999977 : f32
    %26 = vector.broadcast %cst_15 : f32 to vector<4x512xf32>
    %27 = arith.mulf %26, %23 : vector<4x512xf32>
    %28 = arith.select %25, %23, %27 : vector<4x512xi1>, vector<4x512xf32>
    %c17_i32 = arith.constant 17 : i32
    %29 = tpu.dynamic_rotate %28 by %c17_i32 dim 1 : vector<4x512xf32>, i32 -> vector<4x512xf32>
    %c0_16 = arith.constant 0 : index
    %c0_17 = arith.constant 0 : index
    %c0_18 = arith.constant 0 : index
    %30 = vector.load %arg3[%c0_16, %c0_17, %c0_18] : memref<9x1x512xf32, #tpu.memory_space<vmem>>, vector<1x1x512xf32>
    %31 = vector.shape_cast %30 : vector<1x1x512xf32> to vector<1x512xf32>
    %32 = vector.broadcast %31 : vector<1x512xf32> to vector<4x512xf32>
    %33 = arith.mulf %29, %32 : vector<4x512xf32>
    %c16_i32 = arith.constant 16 : i32
    %34 = tpu.dynamic_rotate %28 by %c16_i32 dim 1 : vector<4x512xf32>, i32 -> vector<4x512xf32>
    %c1 = arith.constant 1 : index
    %c0_19 = arith.constant 0 : index
    %c0_20 = arith.constant 0 : index
    %35 = vector.load %arg3[%c1, %c0_19, %c0_20] : memref<9x1x512xf32, #tpu.memory_space<vmem>>, vector<1x1x512xf32>
    %36 = vector.shape_cast %35 : vector<1x1x512xf32> to vector<1x512xf32>
    %37 = vector.broadcast %36 : vector<1x512xf32> to vector<4x512xf32>
    %38 = arith.mulf %34, %37 : vector<4x512xf32>
    %c15_i32 = arith.constant 15 : i32
    %39 = tpu.dynamic_rotate %28 by %c15_i32 dim 1 : vector<4x512xf32>, i32 -> vector<4x512xf32>
    %c2 = arith.constant 2 : index
    %c0_21 = arith.constant 0 : index
    %c0_22 = arith.constant 0 : index
    %40 = vector.load %arg3[%c2, %c0_21, %c0_22] : memref<9x1x512xf32, #tpu.memory_space<vmem>>, vector<1x1x512xf32>
    %41 = vector.shape_cast %40 : vector<1x1x512xf32> to vector<1x512xf32>
    %42 = vector.broadcast %41 : vector<1x512xf32> to vector<4x512xf32>
    %43 = arith.mulf %39, %42 : vector<4x512xf32>
    %c1_i32 = arith.constant 1 : i32
    %44 = tpu.dynamic_rotate %28 by %c1_i32 dim 1 : vector<4x512xf32>, i32 -> vector<4x512xf32>
    %c3 = arith.constant 3 : index
    %c0_23 = arith.constant 0 : index
    %c0_24 = arith.constant 0 : index
    %45 = vector.load %arg3[%c3, %c0_23, %c0_24] : memref<9x1x512xf32, #tpu.memory_space<vmem>>, vector<1x1x512xf32>
    %46 = vector.shape_cast %45 : vector<1x1x512xf32> to vector<1x512xf32>
    %47 = vector.broadcast %46 : vector<1x512xf32> to vector<4x512xf32>
    %48 = arith.mulf %44, %47 : vector<4x512xf32>
    %c511_i32 = arith.constant 511 : i32
    %49 = tpu.dynamic_rotate %28 by %c511_i32 dim 1 : vector<4x512xf32>, i32 -> vector<4x512xf32>
    %c5 = arith.constant 5 : index
    %c0_25 = arith.constant 0 : index
    %c0_26 = arith.constant 0 : index
    %50 = vector.load %arg3[%c5, %c0_25, %c0_26] : memref<9x1x512xf32, #tpu.memory_space<vmem>>, vector<1x1x512xf32>
    %51 = vector.shape_cast %50 : vector<1x1x512xf32> to vector<1x512xf32>
    %52 = vector.broadcast %51 : vector<1x512xf32> to vector<4x512xf32>
    %53 = arith.mulf %49, %52 : vector<4x512xf32>
    %c497_i32 = arith.constant 497 : i32
    %54 = tpu.dynamic_rotate %28 by %c497_i32 dim 1 : vector<4x512xf32>, i32 -> vector<4x512xf32>
    %c6 = arith.constant 6 : index
    %c0_27 = arith.constant 0 : index
    %c0_28 = arith.constant 0 : index
    %55 = vector.load %arg3[%c6, %c0_27, %c0_28] : memref<9x1x512xf32, #tpu.memory_space<vmem>>, vector<1x1x512xf32>
    %56 = vector.shape_cast %55 : vector<1x1x512xf32> to vector<1x512xf32>
    %57 = vector.broadcast %56 : vector<1x512xf32> to vector<4x512xf32>
    %58 = arith.mulf %54, %57 : vector<4x512xf32>
    %c496_i32 = arith.constant 496 : i32
    %59 = tpu.dynamic_rotate %28 by %c496_i32 dim 1 : vector<4x512xf32>, i32 -> vector<4x512xf32>
    %c7 = arith.constant 7 : index
    %c0_29 = arith.constant 0 : index
    %c0_30 = arith.constant 0 : index
    %60 = vector.load %arg3[%c7, %c0_29, %c0_30] : memref<9x1x512xf32, #tpu.memory_space<vmem>>, vector<1x1x512xf32>
    %61 = vector.shape_cast %60 : vector<1x1x512xf32> to vector<1x512xf32>
    %62 = vector.broadcast %61 : vector<1x512xf32> to vector<4x512xf32>
    %63 = arith.mulf %59, %62 : vector<4x512xf32>
    %c495_i32 = arith.constant 495 : i32
    %64 = tpu.dynamic_rotate %28 by %c495_i32 dim 1 : vector<4x512xf32>, i32 -> vector<4x512xf32>
    %c8 = arith.constant 8 : index
    %c0_31 = arith.constant 0 : index
    %c0_32 = arith.constant 0 : index
    %65 = vector.load %arg3[%c8, %c0_31, %c0_32] : memref<9x1x512xf32, #tpu.memory_space<vmem>>, vector<1x1x512xf32>
    %66 = vector.shape_cast %65 : vector<1x1x512xf32> to vector<1x512xf32>
    %67 = vector.broadcast %66 : vector<1x512xf32> to vector<4x512xf32>
    %68 = arith.mulf %64, %67 : vector<4x512xf32>
    %69 = tpu.concatenate %33, %38, %43, %48, %28, %53, %58, %63, %68 in 0 : vector<4x512xf32>, vector<4x512xf32>, vector<4x512xf32>, vector<4x512xf32>, vector<4x512xf32>, vector<4x512xf32>, vector<4x512xf32>, vector<4x512xf32>, vector<4x512xf32> -> vector<36x512xf32>
    %c0_33 = arith.constant 0 : index
    %c0_34 = arith.constant 0 : index
    %c0_35 = arith.constant 0 : index
    %70 = vector.load %arg8[%c0_33, %c0_34, %c0_35] : memref<2x4x36xbf16, #tpu.memory_space<vmem>>, vector<1x4x36xbf16>
    %71 = vector.shape_cast %70 : vector<1x4x36xbf16> to vector<4x36xbf16>
    %72 = arith.truncf %69 : vector<36x512xf32> to vector<36x512xbf16>
    %cst_36 = arith.constant dense<0.000000e+00> : vector<4x512xf32>
    %73 = tpu.matmul %71, %72, %cst_36 {dimension_numbers = #tpu.dot_dimension_numbers<[1], [0], [0], [1], [0, 0, 1, 1], [], []>} : vector<4x36xbf16>, vector<36x512xbf16>, vector<4x512xf32> -> vector<4x512xf32>
    %c0_37 = arith.constant 0 : index
    %c0_38 = arith.constant 0 : index
    %c0_39 = arith.constant 0 : index
    %74 = vector.load %arg9[%c0_37, %c0_38, %c0_39] : memref<2x4x1xf32, #tpu.memory_space<vmem>>, vector<1x4x1xf32>
    %75 = vector.shape_cast %74 : vector<1x4x1xf32> to vector<4x1xf32>
    %76 = vector.broadcast %75 : vector<4x1xf32> to vector<4x512xf32>
    %77 = arith.addf %73, %76 : vector<4x512xf32>
    %78 = arith.mulf %77, %20 : vector<4x512xf32>
    %79 = arith.addf %78, %21 : vector<4x512xf32>
    %cst_40 = arith.constant 0.000000e+00 : f32
    %80 = vector.broadcast %cst_40 : f32 to vector<4x512xf32>
    %81 = arith.cmpf oge, %79, %80 : vector<4x512xf32>
    %cst_41 = arith.constant 0.00999999977 : f32
    %82 = vector.broadcast %cst_41 : f32 to vector<4x512xf32>
    %83 = arith.mulf %82, %79 : vector<4x512xf32>
    %84 = arith.select %81, %79, %83 : vector<4x512xi1>, vector<4x512xf32>
    %c17_i32_42 = arith.constant 17 : i32
    %85 = tpu.dynamic_rotate %84 by %c17_i32_42 dim 1 : vector<4x512xf32>, i32 -> vector<4x512xf32>
    %c0_43 = arith.constant 0 : index
    %c0_44 = arith.constant 0 : index
    %c0_45 = arith.constant 0 : index
    %86 = vector.load %arg3[%c0_43, %c0_44, %c0_45] : memref<9x1x512xf32, #tpu.memory_space<vmem>>, vector<1x1x512xf32>
    %87 = vector.shape_cast %86 : vector<1x1x512xf32> to vector<1x512xf32>
    %88 = vector.broadcast %87 : vector<1x512xf32> to vector<4x512xf32>
    %89 = arith.mulf %85, %88 : vector<4x512xf32>
    %c16_i32_46 = arith.constant 16 : i32
    %90 = tpu.dynamic_rotate %84 by %c16_i32_46 dim 1 : vector<4x512xf32>, i32 -> vector<4x512xf32>
    %c1_47 = arith.constant 1 : index
    %c0_48 = arith.constant 0 : index
    %c0_49 = arith.constant 0 : index
    %91 = vector.load %arg3[%c1_47, %c0_48, %c0_49] : memref<9x1x512xf32, #tpu.memory_space<vmem>>, vector<1x1x512xf32>
    %92 = vector.shape_cast %91 : vector<1x1x512xf32> to vector<1x512xf32>
    %93 = vector.broadcast %92 : vector<1x512xf32> to vector<4x512xf32>
    %94 = arith.mulf %90, %93 : vector<4x512xf32>
    %c15_i32_50 = arith.constant 15 : i32
    %95 = tpu.dynamic_rotate %84 by %c15_i32_50 dim 1 : vector<4x512xf32>, i32 -> vector<4x512xf32>
    %c2_51 = arith.constant 2 : index
    %c0_52 = arith.constant 0 : index
    %c0_53 = arith.constant 0 : index
    %96 = vector.load %arg3[%c2_51, %c0_52, %c0_53] : memref<9x1x512xf32, #tpu.memory_space<vmem>>, vector<1x1x512xf32>
    %97 = vector.shape_cast %96 : vector<1x1x512xf32> to vector<1x512xf32>
    %98 = vector.broadcast %97 : vector<1x512xf32> to vector<4x512xf32>
    %99 = arith.mulf %95, %98 : vector<4x512xf32>
    %c1_i32_54 = arith.constant 1 : i32
    %100 = tpu.dynamic_rotate %84 by %c1_i32_54 dim 1 : vector<4x512xf32>, i32 -> vector<4x512xf32>
    %c3_55 = arith.constant 3 : index
    %c0_56 = arith.constant 0 : index
    %c0_57 = arith.constant 0 : index
    %101 = vector.load %arg3[%c3_55, %c0_56, %c0_57] : memref<9x1x512xf32, #tpu.memory_space<vmem>>, vector<1x1x512xf32>
    %102 = vector.shape_cast %101 : vector<1x1x512xf32> to vector<1x512xf32>
    %103 = vector.broadcast %102 : vector<1x512xf32> to vector<4x512xf32>
    %104 = arith.mulf %100, %103 : vector<4x512xf32>
    %c511_i32_58 = arith.constant 511 : i32
    %105 = tpu.dynamic_rotate %84 by %c511_i32_58 dim 1 : vector<4x512xf32>, i32 -> vector<4x512xf32>
    %c5_59 = arith.constant 5 : index
    %c0_60 = arith.constant 0 : index
    %c0_61 = arith.constant 0 : index
    %106 = vector.load %arg3[%c5_59, %c0_60, %c0_61] : memref<9x1x512xf32, #tpu.memory_space<vmem>>, vector<1x1x512xf32>
    %107 = vector.shape_cast %106 : vector<1x1x512xf32> to vector<1x512xf32>
    %108 = vector.broadcast %107 : vector<1x512xf32> to vector<4x512xf32>
    %109 = arith.mulf %105, %108 : vector<4x512xf32>
    %c497_i32_62 = arith.constant 497 : i32
    %110 = tpu.dynamic_rotate %84 by %c497_i32_62 dim 1 : vector<4x512xf32>, i32 -> vector<4x512xf32>
    %c6_63 = arith.constant 6 : index
    %c0_64 = arith.constant 0 : index
    %c0_65 = arith.constant 0 : index
    %111 = vector.load %arg3[%c6_63, %c0_64, %c0_65] : memref<9x1x512xf32, #tpu.memory_space<vmem>>, vector<1x1x512xf32>
    %112 = vector.shape_cast %111 : vector<1x1x512xf32> to vector<1x512xf32>
    %113 = vector.broadcast %112 : vector<1x512xf32> to vector<4x512xf32>
    %114 = arith.mulf %110, %113 : vector<4x512xf32>
    %c496_i32_66 = arith.constant 496 : i32
    %115 = tpu.dynamic_rotate %84 by %c496_i32_66 dim 1 : vector<4x512xf32>, i32 -> vector<4x512xf32>
    %c7_67 = arith.constant 7 : index
    %c0_68 = arith.constant 0 : index
    %c0_69 = arith.constant 0 : index
    %116 = vector.load %arg3[%c7_67, %c0_68, %c0_69] : memref<9x1x512xf32, #tpu.memory_space<vmem>>, vector<1x1x512xf32>
    %117 = vector.shape_cast %116 : vector<1x1x512xf32> to vector<1x512xf32>
    %118 = vector.broadcast %117 : vector<1x512xf32> to vector<4x512xf32>
    %119 = arith.mulf %115, %118 : vector<4x512xf32>
    %c495_i32_70 = arith.constant 495 : i32
    %120 = tpu.dynamic_rotate %84 by %c495_i32_70 dim 1 : vector<4x512xf32>, i32 -> vector<4x512xf32>
    %c8_71 = arith.constant 8 : index
    %c0_72 = arith.constant 0 : index
    %c0_73 = arith.constant 0 : index
    %121 = vector.load %arg3[%c8_71, %c0_72, %c0_73] : memref<9x1x512xf32, #tpu.memory_space<vmem>>, vector<1x1x512xf32>
    %122 = vector.shape_cast %121 : vector<1x1x512xf32> to vector<1x512xf32>
    %123 = vector.broadcast %122 : vector<1x512xf32> to vector<4x512xf32>
    %124 = arith.mulf %120, %123 : vector<4x512xf32>
    %125 = tpu.concatenate %89, %94, %99, %104, %84, %109, %114, %119, %124 in 0 : vector<4x512xf32>, vector<4x512xf32>, vector<4x512xf32>, vector<4x512xf32>, vector<4x512xf32>, vector<4x512xf32>, vector<4x512xf32>, vector<4x512xf32>, vector<4x512xf32> -> vector<36x512xf32>
    %c1_74 = arith.constant 1 : index
    %c0_75 = arith.constant 0 : index
    %c0_76 = arith.constant 0 : index
    %126 = vector.load %arg8[%c1_74, %c0_75, %c0_76] : memref<2x4x36xbf16, #tpu.memory_space<vmem>>, vector<1x4x36xbf16>
    %127 = vector.shape_cast %126 : vector<1x4x36xbf16> to vector<4x36xbf16>
    %128 = arith.truncf %125 : vector<36x512xf32> to vector<36x512xbf16>
    %cst_77 = arith.constant dense<0.000000e+00> : vector<4x512xf32>
    %129 = tpu.matmul %127, %128, %cst_77 {dimension_numbers = #tpu.dot_dimension_numbers<[1], [0], [0], [1], [0, 0, 1, 1], [], []>} : vector<4x36xbf16>, vector<36x512xbf16>, vector<4x512xf32> -> vector<4x512xf32>
    %c1_78 = arith.constant 1 : index
    %c0_79 = arith.constant 0 : index
    %c0_80 = arith.constant 0 : index
    %130 = vector.load %arg9[%c1_78, %c0_79, %c0_80] : memref<2x4x1xf32, #tpu.memory_space<vmem>>, vector<1x4x1xf32>
    %131 = vector.shape_cast %130 : vector<1x4x1xf32> to vector<4x1xf32>
    %132 = vector.broadcast %131 : vector<4x1xf32> to vector<4x512xf32>
    %133 = arith.addf %129, %132 : vector<4x512xf32>
    %134 = arith.addf %0, %133 : vector<4x512xf32>
    %c0_81 = arith.constant 0 : index
    %c0_82 = arith.constant 0 : index
    %135 = vector.load %arg10[%c0_81, %c0_82] : memref<4x512xf32, #tpu.memory_space<vmem>>, vector<4x512xf32>
    tpu.vector_store %arg10[%c0_81, %c0_82], %134 {strides = array<i32>} : memref<4x512xf32, #tpu.memory_space<vmem>>, vector<4x512xf32>,
    return
  }
  func.func @transform_0(%arg0: i32) -> (i32, i32) {
    %c0_i32 = arith.constant 0 : i32
    %c0_i32_0 = arith.constant 0 : i32
    %c0_i32_1 = arith.constant 0 : i32
    return %c0_i32, %c0_i32_0 : i32, i32
  }
  func.func @transform_1(%arg0: i32) -> (i32, i32) {
    %c0_i32 = arith.constant 0 : i32
    %c0_i32_0 = arith.constant 0 : i32
    %c0_i32_1 = arith.constant 0 : i32
    return %c0_i32, %c0_i32_0 : i32, i32
  }
  func.func @transform_2(%arg0: i32) -> (i32, i32, i32) {
    %c0_i32 = arith.constant 0 : i32
    %c0_i32_0 = arith.constant 0 : i32
    %c0_i32_1 = arith.constant 0 : i32
    %c0_i32_2 = arith.constant 0 : i32
    return %c0_i32, %c0_i32_0, %c0_i32_1 : i32, i32, i32
  }
  func.func @transform_3(%arg0: i32) -> (i32, i32) {
    %c0_i32 = arith.constant 0 : i32
    %c0_i32_0 = arith.constant 0 : i32
    %c0_i32_1 = arith.constant 0 : i32
    return %c0_i32, %c0_i32_0 : i32, i32
  }
  func.func @transform_4(%arg0: i32) -> (i32, i32) {
    %c0_i32 = arith.constant 0 : i32
    %c0_i32_0 = arith.constant 0 : i32
    %c0_i32_1 = arith.constant 0 : i32
    return %c0_i32, %c0_i32_0 : i32, i32
  }
  func.func @transform_5(%arg0: i32) -> (i32, i32) {
    %c0_i32 = arith.constant 0 : i32
    %c0_i32_0 = arith.constant 0 : i32
    %c0_i32_1 = arith.constant 0 : i32
    return %c0_i32, %c0_i32_0 : i32, i32
  }
  func.func @transform_6(%arg0: i32) -> (i32, i32) {
    %c0_i32 = arith.constant 0 : i32
    %c0_i32_0 = arith.constant 0 : i32
    %c0_i32_1 = arith.constant 0 : i32
    return %c0_i32, %c0_i32_0 : i32, i32
  }
  func.func @transform_7(%arg0: i32) -> (i32, i32, i32) {
    %c0_i32 = arith.constant 0 : i32
    %c0_i32_0 = arith.constant 0 : i32
    %c0_i32_1 = arith.constant 0 : i32
    %c0_i32_2 = arith.constant 0 : i32
    return %c0_i32, %c0_i32_0, %c0_i32_1 : i32, i32, i32
  }
  func.func @transform_8(%arg0: i32) -> (i32, i32, i32) {
    %c0_i32 = arith.constant 0 : i32
    %c0_i32_0 = arith.constant 0 : i32
    %c0_i32_1 = arith.constant 0 : i32
    %c0_i32_2 = arith.constant 0 : i32
    return %c0_i32, %c0_i32_0, %c0_i32_1 : i32, i32, i32
  }
  func.func @transform_9(%arg0: i32) -> (i32, i32) {
    %c0_i32 = arith.constant 0 : i32
    %c0_i32_0 = arith.constant 0 : i32
    %c0_i32_1 = arith.constant 0 : i32
    return %c0_i32, %c0_i32_0 : i32, i32
  }
}

</mosaic_0001>

<bundles_post_ra>
// kernel: residual_block_sft_forward.1
= control target key start
LH: loop header
LB: loop body
LE: loop exit
PB: predicated region body
PF: predicated region fallthrough
CT: control target
= control target key end

     0   :  { %v1133_v2 = vmov 0   ;;  %vm70_vm0 = vcmask 1043456   ;;  %vm66_vm1 = vcmask 64512   ;;  %vm186_vm6 = vcmask 130048   ;;  %s1134_s23 = smov 17   ;;  %s1135_s24 = smov 16   ;;  %s1888_s1 = inlined_call_operand.vmem [shape: bf16[8,512], index: 1, kind: input, shape index: {}]   ;;  %s1889_s4 = inlined_call_operand.vmem [shape: f32[16,1], index: 4, kind: input, shape index: {}]   ;;  %s1890_s3 = inlined_call_operand.vmem [shape: bf16[16,8], index: 3, kind: input, shape index: {}]   ;;  %s1891_s6 = inlined_call_operand.vmem [shape: f32[16,1], index: 6, kind: input, shape index: {}]   ;;  %s1892_s5 = inlined_call_operand.vmem [shape: bf16[16,16], index: 5, kind: input, shape index: {}]   ;;  %s1893_s0 = inlined_call_operand.vmem [shape: f32[4,512], index: 0, kind: input, shape index: {}]   ;;  %s1894_s8 = inlined_call_operand.vmem [shape: f32[2,4,1], index: 8, kind: input, shape index: {}]   ;;  %s1895_s2 = inlined_call_operand.vmem [shape: f32[9,1,512], index: 2, kind: input, shape index: {}]   ;;  %s1896_s7 = inlined_call_operand.vmem [shape: bf16[2,4,36], index: 7, kind: input, shape index: {}]   ;;  %s1897_s9 = inlined_call_operand.vmem [shape: f32[4,512], index: 9, kind: output, shape index: {}]  }
   0x1   :  { %v37_v0 = vld [vmem:[%s1888_s1] sm:$0xff]  ;;  %v38_v1 = vld [vmem:[%s1888_s1 + $0x8] sm:$0xff]  ;;  %1128 = vset.pattern.permute.xlu0 %v1133_v2  ;;  %1129 = vset.pattern.permute.xlu1 %v1133_v2  ;;  %s1136_s25 = smov 15   ;;  %s1137_s26 = smov 1  }
   0x2   :  { %v58_v3 = vunpack.c.l.b16 %v37_v0  ;;  %v59_v4 = vunpack.c.h.b16 %v37_v0  ;;  %v60_v5 = vunpack.c.l.b16 %v38_v1  ;;  %v61_v6 = vunpack.c.h.b16 %v38_v1  ;;  %v39_v7 = vld [vmem:[%s1889_s4] sm:$0xff]  ;;  %1130 = vset.pattern.permute.xlu2 %v1133_v2  ;;  %v40_v17 = vld [vmem:[%s1889_s4 + $0x8] sm:$0xff]  ;;  %s1138_s27 = smov 127   ;;  %s1139_s28 = smov 113  }
   0x3   :  { %43 = vperm.xlu0 %1128, %v39_v7   ;;  %v1117_v16 = vld [vmem:[%s1890_s3] sm:$0xff]  ;;  %s1140_s29 = smov 112   ;;  %s1141_s30 = smov 111  }
   0x4   :  { %v62_v8 = vpack.c.b16 %v58_v3, %v58_v3  ;;  %v63_v9 = vpack.c.b16 %v59_v4, %v59_v4  ;;  %v64_v10 = vpack.c.b16 %v60_v5, %v60_v5  ;;  %v65_v11 = vpack.c.b16 %v61_v6, %v61_v6  ;;  %v169_v18 = vld [vmem:[%s1891_s6] sm:$0xff] }
   0x5   :  { %173 = vperm.xlu1 %1129, %v169_v18   ;;  %v1118_v45 = vld [vmem:[%s1892_s5] sm:$0xff] }
   0x6   :  { %v72_v12 = vsel %vm70_vm0, %v62_v8, 0  ;;  %v75_v13 = vsel %vm70_vm0, %v63_v9, 0  ;;  %v78_v14 = vsel %vm70_vm0, %v64_v10, 0  ;;  %v81_v15 = vsel %vm70_vm0, %v65_v11, 0  ;;  %v33_v0 = vld [vmem:[%s1893_s0] sm:$0xff] }
   0x7   :  { %90 = vmatpush.bf16.msra.mxu0 %v72_v12  ;;  %104 = vmatpush.bf16.msra.mxu1 %v75_v13  ;;  %v34_v12 = vld [vmem:[%s1893_s0 + $0x8] sm:$0xff] }
   0x8   :  { %118 = vmatpush.bf16.msra.mxu2 %v78_v14  ;;  %132 = vmatpush.bf16.msra.mxu3 %v81_v15 }
   0xa   :  { %1088 = vmatmul.msk.bf16.vlgmr.msra.gmra.mxu0 %vm66_vm1, %v1117_v16  ;;  %1089 = vmatmul.msk.bf16.vlgmr.msra.gmra.mxu1 %vm66_vm1, %v1117_v16 }
   0xb   :  { %1090 = vmatmul.msk.bf16.vlgmr.msra.gmra.mxu2 %vm66_vm1, %v1117_v16  ;;  %1091 = vmatmul.msk.bf16.vlgmr.msra.gmra.mxu3 %vm66_vm1, %v1117_v16 }
   0xc   :  { %48 = vperm.xlu0 %1128, %v40_v17  }
  0x75   :  { %v44_v19 = vpop.permute.xlu0 %43 }
  0x77   :  { %v174_v58 = vpop.permute.xlu1 %173 }
  0x7e   :  { %v49_v24 = vpop.permute.xlu0 %48 }
  0x87   :  { %v92_v20 = vpop.f32.mrf.mxu0  ;;  %v106_v21 = vpop.f32.mrf.mxu1 }
  0x88   :  { %v93_v22 = vadd.f32 %v92_v20, %v44_v19  ;;  %v107_v23 = vadd.f32 %v106_v21, %v44_v19 }
  0x8a   :  { %v147_v29 = vmul.f32 0.01, %v93_v22  ;;  %v148_v30 = vmul.f32 0.01, %v107_v23  ;;  %vm139_vm2 = vcmp.ge.f32.partialorder %v93_v22, 0.0  ;;  %vm140_vm3 = vcmp.ge.f32.partialorder %v107_v23, 0.0 }
  0x8c   :  { %v155_v37 = vsel %vm139_vm2, %v93_v22, %v147_v29  ;;  %v156_v39 = vsel %vm140_vm3, %v107_v23, %v148_v30 }
  0x8e   :  { %v120_v25 = vpop.f32.mrf.mxu2  ;;  %v134_v26 = vpop.f32.mrf.mxu3 }
  0x8f   :  { %v94_v27 = vpop.f32.mrf.mxu0  ;;  %v108_v28 = vpop.f32.mrf.mxu1  ;;  %v121_v35 = vadd.f32 %v120_v25, %v44_v19  ;;  %v135_v36 = vadd.f32 %v134_v26, %v44_v19 }
  0x90   :  { %v95_v31 = vadd.f32 %v94_v27, %v49_v24  ;;  %v109_v32 = vadd.f32 %v108_v28, %v49_v24 }
  0x91   :  { %v149_v46 = vmul.f32 0.01, %v121_v35  ;;  %v150_v47 = vmul.f32 0.01, %v135_v36  ;;  %vm141_vm7 = vcmp.ge.f32.partialorder %v121_v35, 0.0  ;;  %vm142_vm8 = vcmp.ge.f32.partialorder %v135_v36, 0.0 }
  0x92   :  { %v151_v33 = vmul.f32 0.01, %v95_v31  ;;  %v152_v34 = vmul.f32 0.01, %v109_v32  ;;  %vm143_vm4 = vcmp.ge.f32.partialorder %v95_v31, 0.0  ;;  %vm144_vm5 = vcmp.ge.f32.partialorder %v109_v32, 0.0 }
  0x93   :  { %v157_v52 = vsel %vm141_vm7, %v121_v35, %v149_v46  ;;  %v158_v54 = vsel %vm142_vm8, %v135_v36, %v150_v47  ;;  %vm685_vm7 = vcmask 293888  }
  0x94   :  { %v159_v38 = vsel %vm143_vm4, %v95_v31, %v151_v33  ;;  %v160_v40 = vsel %vm144_vm5, %v109_v32, %v152_v34  ;;  %vm689_vm5 = vcmask 1041408  }
  0x95   :  { %v165_v41 = vpack.c.bf16 %v159_v38, %v155_v37  ;;  %v166_v42 = vpack.c.bf16 %v160_v40, %v156_v39 }
  0x96   :  { %v122_v43 = vpop.f32.mrf.mxu2  ;;  %v136_v44 = vpop.f32.mrf.mxu3 }
  0x97   :  { %v123_v48 = vadd.f32 %v122_v43, %v49_v24  ;;  %v137_v49 = vadd.f32 %v136_v44, %v49_v24  ;;  %197 = vmatpush.bf16.msrb.mxu0 %v165_v41  ;;  %211 = vmatpush.bf16.msrb.mxu1 %v166_v42 }
  0x99   :  { %v153_v50 = vmul.f32 0.01, %v123_v48  ;;  %v154_v51 = vmul.f32 0.01, %v137_v49  ;;  %vm145_vm9 = vcmp.ge.f32.partialorder %v123_v48, 0.0  ;;  %vm146_vm10 = vcmp.ge.f32.partialorder %v137_v49, 0.0 }
  0x9a   :  { %1096 = vmatmul.msk.bf16.vlgmr.msrb.gmra.mxu0 %vm186_vm6, %v1118_v45  ;;  %1097 = vmatmul.msk.bf16.vlgmr.msrb.gmra.mxu1 %vm186_vm6, %v1118_v45 }
  0x9b   :  { %v161_v53 = vsel %vm145_vm9, %v123_v48, %v153_v50  ;;  %v162_v55 = vsel %vm146_vm10, %v137_v49, %v154_v51  ;;  %v679_v51 = vld [vmem:[%s1894_s8] sm:$0xf] }
  0x9c   :  { %v167_v56 = vpack.c.bf16 %v161_v53, %v157_v52  ;;  %v168_v57 = vpack.c.bf16 %v162_v55, %v158_v54  ;;  %v170_v52 = vld [vmem:[%s1891_s6 + $0x8] sm:$0xff] }
  0x9e   :  { %225 = vmatpush.bf16.msrb.mxu2 %v167_v56  ;;  %239 = vmatpush.bf16.msrb.mxu3 %v168_v57 }
  0xa1   :  { %1098 = vmatmul.msk.bf16.vlgmr.msrb.gmra.mxu2 %vm186_vm6, %v1118_v45  ;;  %1099 = vmatmul.msk.bf16.vlgmr.msrb.gmra.mxu3 %vm186_vm6, %v1118_v45 }
 0x117   :  { %v199_v59 = vpop.f32.mrf.mxu0  ;;  %v213_v60 = vpop.f32.mrf.mxu1 }
 0x118   :  { %v200_v61 = vadd.f32 %v199_v59, %v174_v58  ;;  %v214_v62 = vadd.f32 %v213_v60, %v174_v58 }
 0x11a   :  { %258 = vst.sshfl [vmem:[#allocation1] sm:$0xff pattern:$0x75316420] %v200_v61  ;;  %v250_v63 = vrot.slane %v214_v62, 4 }
 0x11b   :  { %259 = vst.sshfl [vmem:[#allocation1 + $0x8] sm:$0xff pattern:$0x75316420] %v214_v62 }
 0x11c   :  { %v252_v1 = vsel %vm70_vm0, %v200_v61, %v250_v63 }
 0x11d   :  { %v256_v2 = vmul.f32 %v252_v1, %v33_v0  ;;  %v297_v0 = vlaneseq }
 0x11f   :  { %v1317_v1 = vand.u32 127, %v297_v0  ;;  %v1438_v0 = vld [vmem:[%s1895_s2 + $0x1c] sm:$0xf] }
 0x121   :  { %vm337_vm13 = vcmp.lt.s32.totalorder %v1317_v1, 16  ;;  %vm299_vm14 = vcmp.lt.s32.totalorder %v1317_v1, 17  ;;  %vm376_vm15 = vcmp.lt.s32.totalorder %v1317_v1, 15  ;;  %vm415_vm1 = vcmp.lt.s32.totalorder %v1317_v1, 1 }
 0x122   :  { %v263_v3 = vld [vmem:[#allocation1 + $0x1] ss:$2 sm:$0xff]  ;;  %vm571_vm2 = vcmp.lt.s32.totalorder %v1317_v1, 111  ;;  %vm454_vm3 = vcmp.lt.s32.totalorder %v1317_v1, 127  ;;  %vm532_vm4 = vcmp.lt.s32.totalorder %v1317_v1, 112  ;;  %vm493_vm6 = vcmp.lt.s32.totalorder %v1317_v1, 113 }
 0x123   :  { %v268_v4 = vadd.f32 %v263_v3, %v256_v2  ;;  %v1324_v3 = vld [vmem:[%s1895_s2 + $0x4] sm:$0xf] }
 0x124   :  { %v227_v5 = vpop.f32.mrf.mxu2  ;;  %v241_v6 = vpop.f32.mrf.mxu3 }
 0x125   :  { %vm270_vm11 = vcmp.ge.f32.partialorder %v268_v4, 0.0  ;;  %v272_v7 = vmul.f32 0.01, %v268_v4  ;;  %v228_v8 = vadd.f32 %v227_v5, %v174_v58  ;;  %v242_v9 = vadd.f32 %v241_v6, %v174_v58 }
 0x126   :  { %v347_v6 = vperm.slane %v1324_v3, 2 }
 0x127   :  { %v1225_v10 = vsel %vm270_vm11, %v268_v4, %v272_v7  ;;  %260 = vst.sshfl [vmem:[#allocation1 + $0x10] sm:$0xff pattern:$0x75316420] %v228_v8  ;;  %v251_v11 = vrot.slane %v242_v9, 4  ;;  %v1901_v7 = vperm.slane %v1324_v3, 3 }
 0x128   :  { %278 = vst [vmem:[#allocation1] ss:$2 sm:$0xff] %v1225_v10 }
 0x129   :  { %261 = vst.sshfl [vmem:[#allocation1 + $0x18] sm:$0xff pattern:$0x75316420] %v242_v9  ;;  %v253_v13 = vsel %vm70_vm0, %v228_v8, %v251_v11  ;;  %v1347_v11 = vld [vmem:[%s1895_s2] sm:$0xf] }
 0x12a   :  { %v257_v14 = vmul.f32 %v253_v13, %v34_v12  ;;  %v1354_v12 = vld [vmem:[%s1895_s2 + $0x8] sm:$0xf] }
 0x12f   :  { %v282_v15 = vld.sshfl [vmem:[#allocation1 + $0x8] sm:$0xff pattern:$0x75316420]  ;;  %v1232_v16 = vld.sshfl [vmem:[#allocation1] sm:$0xff pattern:$0x75316420] }
 0x130   :  { %v265_v17 = vld [vmem:[#allocation1 + $0x11] ss:$2 sm:$0xff]  ;;  %291 = vrot.lane.b32.xlu1 %v282_v15, %s1134_s23  ;;  %318 = vst [vmem:[#allocation1] ss:$2 sm:$0xff] %v1225_v10 }
 0x131   :  { %v269_v18 = vadd.f32 %v265_v17, %v257_v14 }
 0x133   :  { %vm271_vm12 = vcmp.ge.f32.partialorder %v269_v18, 0.0  ;;  %v273_v19 = vmul.f32 0.01, %v269_v18 }
 0x135   :  { %v1236_v20 = vsel %vm271_vm12, %v269_v18, %v273_v19  ;;  %v1903_v18 = vperm.slane %v1347_v11, 2  ;;  %v1899_v19 = vperm.slane %v1347_v11, 3 }
 0x136   :  { %280 = vst [vmem:[#allocation1 + $0x10] ss:$2 sm:$0xff] %v1236_v20 }
 0x137   :  { %v322_v21 = vld.sshfl [vmem:[#allocation1 + $0x8] sm:$0xff pattern:$0x75316420]  ;;  %v1239_v22 = vld.sshfl [vmem:[#allocation1] sm:$0xff pattern:$0x75316420] }
 0x138   :  { %331 = vrot.lane.b32.xlu0 %v322_v21, %s1135_s24  ;;  %357 = vst [vmem:[#allocation1] ss:$2 sm:$0xff] %v1225_v10 }
 0x13d   :  { %v283_v23 = vld.sshfl [vmem:[#allocation1 + $0x10] sm:$0xff pattern:$0x75316420]  ;;  %v284_v24 = vld.sshfl [vmem:[#allocation1 + $0x18] sm:$0xff pattern:$0x75316420] }
 0x13e   :  { %293 = vrot.lane.b32.xlu2 %v283_v23, %s1134_s23  ;;  %320 = vst [vmem:[#allocation1 + $0x10] ss:$2 sm:$0xff] %v1236_v20  ;;  %v1898_v23 = vperm.slane %v1354_v12, 3 }
 0x13f   :  { %v361_v25 = vld.sshfl [vmem:[#allocation1 + $0x8] sm:$0xff pattern:$0x75316420]  ;;  %v1245_v26 = vld.sshfl [vmem:[#allocation1] sm:$0xff pattern:$0x75316420] }
 0x140   :  { %295 = vrot.lane.b32.xlu0 %v284_v24, %s1134_s23  ;;  %370 = vrot.lane.b32.xlu1 %v361_v25, %s1136_s25  ;;  %396 = vst [vmem:[#allocation1] ss:$2 sm:$0xff] %v1225_v10 }
 0x145   :  { %v324_v27 = vld.sshfl [vmem:[#allocation1 + $0x18] sm:$0xff pattern:$0x75316420]  ;;  %v323_v28 = vld.sshfl [vmem:[#allocation1 + $0x10] sm:$0xff pattern:$0x75316420] }
 0x146   :  { %335 = vrot.lane.b32.xlu2 %v324_v27, %s1135_s24  ;;  %359 = vst [vmem:[#allocation1 + $0x10] ss:$2 sm:$0xff] %v1236_v20 }
 0x147   :  { %v400_v29 = vld.sshfl [vmem:[#allocation1 + $0x8] sm:$0xff pattern:$0x75316420]  ;;  %v1252_v30 = vld.sshfl [vmem:[#allocation1] sm:$0xff pattern:$0x75316420] }
 0x148   :  { %333 = vrot.lane.b32.xlu1 %v323_v28, %s1135_s24  ;;  %409 = vrot.lane.b32.xlu0 %v400_v29, %s1137_s26  ;;  %435 = vst [vmem:[#allocation1] ss:$2 sm:$0xff] %v1225_v10 }
 0x14d   :  { %v362_v31 = vld.sshfl [vmem:[#allocation1 + $0x10] sm:$0xff pattern:$0x75316420]  ;;  %v363_v32 = vld.sshfl [vmem:[#allocation1 + $0x18] sm:$0xff pattern:$0x75316420] }
 0x14e   :  { %372 = vrot.lane.b32.xlu2 %v362_v31, %s1136_s25  ;;  %398 = vst [vmem:[#allocation1 + $0x10] ss:$2 sm:$0xff] %v1236_v20 }
 0x14f   :  { %v439_v33 = vld.sshfl [vmem:[#allocation1 + $0x8] sm:$0xff pattern:$0x75316420]  ;;  %v438_v34 = vld.sshfl [vmem:[#allocation1] sm:$0xff pattern:$0x75316420] }
 0x150   :  { %374 = vrot.lane.b32.xlu0 %v363_v32, %s1136_s25  ;;  %448 = vrot.lane.b32.xlu1 %v439_v33, %s1138_s27  ;;  %474 = vst [vmem:[#allocation1] ss:$2 sm:$0xff] %v1225_v10 }
 0x155   :  { %v402_v35 = vld.sshfl [vmem:[#allocation1 + $0x18] sm:$0xff pattern:$0x75316420]  ;;  %v401_v36 = vld.sshfl [vmem:[#allocation1 + $0x10] sm:$0xff pattern:$0x75316420] }
 0x156   :  { %413 = vrot.lane.b32.xlu2 %v402_v35, %s1137_s26  ;;  %437 = vst [vmem:[#allocation1 + $0x10] ss:$2 sm:$0xff] %v1236_v20 }
 0x157   :  { %v478_v37 = vld.sshfl [vmem:[#allocation1 + $0x8] sm:$0xff pattern:$0x75316420]  ;;  %v477_v38 = vld.sshfl [vmem:[#allocation1] sm:$0xff pattern:$0x75316420] }
 0x158   :  { %411 = vrot.lane.b32.xlu1 %v401_v36, %s1137_s26  ;;  %446 = vrot.lane.b32.xlu0 %v438_v34, %s1138_s27  ;;  %513 = vst [vmem:[#allocation1] ss:$2 sm:$0xff] %v1225_v10 }
 0x15d   :  { %v441_v39 = vld.sshfl [vmem:[#allocation1 + $0x18] sm:$0xff pattern:$0x75316420]  ;;  %v440_v40 = vld.sshfl [vmem:[#allocation1 + $0x10] sm:$0xff pattern:$0x75316420] }
 0x15e   :  { %452 = vrot.lane.b32.xlu2 %v441_v39, %s1138_s27  ;;  %476 = vst [vmem:[#allocation1 + $0x10] ss:$2 sm:$0xff] %v1236_v20 }
 0x15f   :  { %v517_v41 = vld.sshfl [vmem:[#allocation1 + $0x8] sm:$0xff pattern:$0x75316420]  ;;  %v516_v42 = vld.sshfl [vmem:[#allocation1] sm:$0xff pattern:$0x75316420] }
 0x160   :  { %450 = vrot.lane.b32.xlu1 %v440_v40, %s1138_s27  ;;  %485 = vrot.lane.b32.xlu0 %v477_v38, %s1139_s28  ;;  %552 = vst [vmem:[#allocation1] ss:$2 sm:$0xff] %v1225_v10 }
 0x165   :  { %v480_v43 = vld.sshfl [vmem:[#allocation1 + $0x18] sm:$0xff pattern:$0x75316420]  ;;  %v479_v44 = vld.sshfl [vmem:[#allocation1 + $0x10] sm:$0xff pattern:$0x75316420] }
 0x166   :  { %491 = vrot.lane.b32.xlu2 %v480_v43, %s1139_s28  ;;  %515 = vst [vmem:[#allocation1 + $0x10] ss:$2 sm:$0xff] %v1236_v20 }
 0x167   :  { %v556_v45 = vld.sshfl [vmem:[#allocation1 + $0x8] sm:$0xff pattern:$0x75316420]  ;;  %v555_v46 = vld.sshfl [vmem:[#allocation1] sm:$0xff pattern:$0x75316420] }
 0x168   :  { %489 = vrot.lane.b32.xlu1 %v479_v44, %s1139_s28  ;;  %524 = vrot.lane.b32.xlu0 %v516_v42, %s1140_s29  ;;  %615 = vst [vmem:[#allocation1] ss:$2 sm:$0xff] %v1225_v10  ;;  %v1342_v10 = vld [vmem:[%s1895_s2 + $0xc] sm:$0xf] }
 0x169   :  { %v1900_v17 = vperm.slane %v1342_v10, 3 }
 0x16d   :  { %v518_v47 = vld.sshfl [vmem:[#allocation1 + $0x10] sm:$0xff pattern:$0x75316420]  ;;  %v519_v48 = vld.sshfl [vmem:[#allocation1 + $0x18] sm:$0xff pattern:$0x75316420] }
 0x16e   :  { %530 = vrot.lane.b32.xlu2 %v519_v48, %s1140_s29  ;;  %554 = vst [vmem:[#allocation1 + $0x10] ss:$2 sm:$0xff] %v1236_v20 }
 0x170   :  { %565 = vrot.lane.b32.xlu0 %v556_v45, %s1141_s30  ;;  %563 = vrot.lane.b32.xlu1 %v555_v46, %s1141_s30 }
 0x175   :  { %v557_v49 = vld.sshfl [vmem:[#allocation1 + $0x10] sm:$0xff pattern:$0x75316420]  ;;  %v558_v50 = vld.sshfl [vmem:[#allocation1 + $0x18] sm:$0xff pattern:$0x75316420] }
 0x176   :  { %567 = vrot.lane.b32.xlu2 %v557_v49, %s1141_s30  ;;  %617 = vst [vmem:[#allocation1 + $0x10] ss:$2 sm:$0xff] %v1236_v20  ;;  %v1420_v49 = vld [vmem:[%s1895_s2 + $0x20] sm:$0xf] }
 0x178   :  { %487 = vrot.lane.b32.xlu0 %v478_v37, %s1139_s28  ;;  %528 = vrot.lane.b32.xlu1 %v518_v47, %s1140_s29 }
 0x17e   :  { %569 = vrot.lane.b32.xlu2 %v558_v50, %s1141_s30  ;;  %v581_v50 = vperm.slane %v1420_v49, 2 }
 0x180   :  { %289 = vrot.lane.b32.xlu0 %v1232_v16, %s1134_s23  ;;  %329 = vrot.lane.b32.xlu1 %v1239_v22, %s1135_s24  ;;  %v425_v16 = vperm.slane %v1342_v10, 2  ;;  %v1902_v22 = vperm.slane %v1354_v12, 2 }
 0x186   :  { %526 = vrot.lane.b32.xlu2 %v517_v41, %s1140_s29 }
 0x188   :  { %682 = vperm.xlu0 %1128, %v679_v51   ;;  %368 = vrot.lane.b32.xlu1 %v1245_v26, %s1136_s25 }
 0x18e   :  { %407 = vrot.lane.b32.xlu2 %v1252_v30, %s1137_s26 }
 0x196   :  { %178 = vperm.xlu2 %1130, %v170_v52  }
 0x198   :  { %v294_v53 = vpop.permute.xlu2 %293 }
 0x1a0   :  { %v1301_v54 = vpop.permute.xlu2 %335 }
 0x1a2   :  { %v1303_v56 = vpop.permute.xlu1 %291 }
 0x1a3   :  { %v301_v20 = vsel %vm299_vm14, %v1303_v56, %v294_v53 }
 0x1a4   :  { %v316_v34 = vmul.f32 %v1903_v18, %v301_v20  ;;  %v618_v18 = vld.sshfl [vmem:[#allocation1] sm:$0xff pattern:$0x75316420] }
 0x1a8   :  { %v373_v55 = vpop.permute.xlu2 %372 }
 0x1aa   :  { %v1305_v57 = vpop.permute.xlu0 %331 }
 0x1b0   :  { %v1307_v58 = vpop.permute.xlu2 %413 }
 0x1b2   :  { %v1309_v59 = vpop.permute.xlu0 %295  ;;  %v1311_v60 = vpop.permute.xlu1 %370 }
 0x1b3   :  { %v300_v21 = vsel %vm299_vm14, %v294_v53, %v1309_v59  ;;  %v378_v26 = vsel %vm376_vm15, %v1311_v60, %v373_v55  ;;  %v1429_v53 = vld [vmem:[%s1895_s2 + $0x14] sm:$0xf] }
 0x1b4   :  { %v317_v35 = vmul.f32 %v1899_v19, %v300_v21  ;;  %v394_v36 = vmul.f32 %v1902_v22, %v378_v26  ;;  %v462_v26 = vperm.slane %v1429_v53, 0 }
 0x1b8   :  { %v1313_v61 = vpop.permute.xlu2 %452 }
 0x1ba   :  { %v334_v62 = vpop.permute.xlu1 %333  ;;  %v1315_v63 = vpop.permute.xlu0 %409 }
 0x1bb   :  { %v338_v8 = vsel %vm337_vm13, %v334_v62, %v1301_v54  ;;  %v339_v9 = vsel %vm337_vm13, %v1305_v57, %v334_v62 }
 0x1bc   :  { %v355_v13 = vmul.f32 %v347_v6, %v339_v9  ;;  %v356_v14 = vmul.f32 %v1901_v7, %v338_v8 }
 0x1be   :  { %v597_v30 = vrot.slane %v355_v13, 4  ;;  %v598_v31 = vrot.slane %v356_v14, 4  ;;  %v465_v13 = vperm.slane %v1429_v53, 3  ;;  %v543_v14 = vperm.slane %v1438_v0, 3 }
 0x1c0   :  { %v1319_v2 = vpop.permute.xlu2 %491  ;;  %v1400_v41 = vsel %vm70_vm0, %v317_v35, %v598_v31  ;;  %v1406_v43 = vsel %vm70_vm0, %v316_v34, %v597_v30  ;;  %v579_v30 = vperm.slane %v1420_v49, 0  ;;  %v582_v31 = vperm.slane %v1420_v49, 3 }
 0x1c1   :  { %v463_v35 = vperm.slane %v1429_v53, 1 }
 0x1c2   :  { %v1327_v4 = vpop.permute.xlu0 %374  ;;  %v1329_v5 = vpop.permute.xlu1 %448 }
 0x1c3   :  { %v377_v27 = vsel %vm376_vm15, %v373_v55, %v1327_v4 }
 0x1c4   :  { %v395_v37 = vmul.f32 %v1898_v23, %v377_v27  ;;  %v1455_v27 = vld [vmem:[%s1895_s2 + $0x18] sm:$0xf] }
 0x1c8   :  { %v1361_v15 = vpop.permute.xlu2 %530 }
 0x1ca   :  { %v412_v24 = vpop.permute.xlu1 %411  ;;  %v447_v25 = vpop.permute.xlu0 %446 }
 0x1cb   :  { %v416_v28 = vsel %vm415_vm1, %v412_v24, %v1307_v58  ;;  %v417_v29 = vsel %vm415_vm1, %v1315_v63, %v412_v24  ;;  %v458_v20 = vsel %vm454_vm3, %v1313_v61, %v447_v25 }
 0x1cc   :  { %v433_v32 = vmul.f32 %v425_v16, %v417_v29  ;;  %v434_v33 = vmul.f32 %v1900_v17, %v416_v28  ;;  %v457_v28 = vsel %vm454_vm3, %v447_v25, %v1329_v5  ;;  %v580_v29 = vperm.slane %v1420_v49, 1 }
 0x1cd   :  { %v504_v25 = vperm.slane %v1455_v27, 3 }
 0x1ce   :  { %v609_v38 = vrot.slane %v433_v32, 4  ;;  %v610_v39 = vrot.slane %v434_v33, 4  ;;  %v473_v32 = vmul.f32 %v465_v13, %v458_v20 }
 0x1d0   :  { %v568_v40 = vpop.permute.xlu2 %567  ;;  %v1403_v42 = vsel %vm70_vm0, %v395_v37, %v610_v39  ;;  %v1409_v44 = vsel %vm70_vm0, %v394_v36, %v609_v38  ;;  %v464_v36 = vperm.slane %v1429_v53, 2  ;;  %v540_v37 = vperm.slane %v1438_v0, 0 }
 0x1d1   :  { %v670_v45 = vpack.c.bf16 %v1403_v42, %v1400_v41  ;;  %v669_v46 = vpack.c.bf16 %v1409_v44, %v1406_v43  ;;  %v633_v23 = vrot.slane %v473_v32, 4  ;;  %v501_v32 = vperm.slane %v1455_v27, 0 }
 0x1d2   :  { %v451_v47 = vpop.permute.xlu1 %450  ;;  %v1415_v48 = vpop.permute.xlu0 %485 }
 0x1d3   :  { %v456_v19 = vsel %vm454_vm3, %v1329_v5, %v451_v47 }
 0x1d4   :  { %v471_v5 = vmul.f32 %v463_v35, %v456_v19 }
 0x1d8   :  { %v570_v51 = vpop.permute.xlu2 %569 }
 0x1d9   :  { %v572_v52 = vsel %vm571_vm2, %v568_v40, %v570_v51 }
 0x1da   :  { %v589_v55 = vmul.f32 %v581_v50, %v572_v52  ;;  %v1433_v62 = vpop.permute.xlu1 %489  ;;  %v525_v8 = vpop.permute.xlu0 %524  ;;  %v470_v52 = vmul.f32 %v462_v26, %v457_v28 }
 0x1db   :  { %v536_v21 = vsel %vm532_vm4, %v1361_v15, %v525_v8 }
 0x1dc   :  { %v677_v9 = vpack.c.bf16 %v589_v55, %v589_v55  ;;  %v551_v33 = vmul.f32 %v543_v14, %v536_v21  ;;  %v497_v21 = vsel %vm493_vm6, %v1319_v2, %v1415_v48 }
 0x1de   :  { %v697_v24 = vsel %vm689_vm5, %v677_v9, 0 }
 0x1df   :  { %733 = vmatpush.bf16.msra.mxu2 %v697_v24 }
 0x1e0   :  { %v527_v34 = vpop.permute.xlu2 %526 }
 0x1e2   :  { %v566_v38 = vpop.permute.xlu0 %565  ;;  %v564_v39 = vpop.permute.xlu1 %563 }
 0x1e3   :  { %v573_v55 = vsel %vm571_vm2, %v566_v38, %v568_v40  ;;  %v574_v9 = vsel %vm571_vm2, %v564_v39, %v566_v38  ;;  %v575_v20 = vsel %vm571_vm2, %v570_v51, %v564_v39  ;;  %v455_v38 = vsel %vm454_vm3, %v451_v47, %v1313_v61 }
 0x1e4   :  { %v588_v24 = vmul.f32 %v580_v29, %v573_v55  ;;  %v587_v28 = vmul.f32 %v579_v30, %v574_v9  ;;  %v590_v40 = vmul.f32 %v582_v31, %v575_v20  ;;  %v645_v51 = vrot.slane %v551_v33, 4 }
 0x1e5   :  { %v535_v39 = vsel %vm532_vm4, %v525_v8, %v527_v34  ;;  %v512_v9 = vmul.f32 %v504_v25, %v497_v21  ;;  %v541_v20 = vperm.slane %v1438_v0, 1  ;;  %v472_v47 = vmul.f32 %v464_v36, %v455_v38 }
 0x1e6   :  { %v676_v55 = vpack.c.bf16 %v588_v24, %v588_v24  ;;  %v675_v17 = vpack.c.bf16 %v587_v28, %v587_v28  ;;  %v678_v7 = vpack.c.bf16 %v590_v40, %v590_v40  ;;  %v548_v61 = vmul.f32 %v540_v37, %v535_v39  ;;  %v621_v24 = vld.sshfl [vmem:[#allocation1 + $0x18] sm:$0xff pattern:$0x75316420] }
 0x1e7   :  { %v542_v21 = vperm.slane %v1438_v0, 2  ;;  %v665_v28 = vsel %vm70_vm0, %v512_v9, %v645_v51  ;;  %v630_v40 = vrot.slane %v470_v52, 4  ;;  %v502_v39 = vperm.slane %v1455_v27, 1 }
 0x1e8   :  { %v691_v33 = vsel %vm689_vm5, %v675_v17, 0  ;;  %v694_v8 = vsel %vm689_vm5, %v676_v55, 0  ;;  %v700_v22 = vsel %vm689_vm5, %v678_v7, 0  ;;  %v503_v17 = vperm.slane %v1455_v27, 2 }
 0x1e9   :  { %707 = vmatpush.bf16.msra.mxu0 %v691_v33  ;;  %720 = vmatpush.bf16.msra.mxu1 %v694_v8  ;;  %v661_v19 = vsel %vm70_vm0, %v621_v24, %v633_v23  ;;  %v494_v38 = vsel %vm493_vm6, %v1433_v62, %v1319_v2  ;;  %v642_v51 = vrot.slane %v548_v61, 4  ;;  %v631_v8 = vrot.slane %v471_v5, 4 }
 0x1ea   :  { %746 = vmatpush.bf16.msra.mxu3 %v700_v22  ;;  %v488_v7 = vpop.permute.xlu0 %487  ;;  %v529_v55 = vpop.permute.xlu1 %528  ;;  %v674_v2 = vpack.c.bf16 %v665_v28, %v661_v19  ;;  %v632_v24 = vrot.slane %v472_v47, 4  ;;  %v658_v61 = vsel %vm70_vm0, %v618_v18, %v630_v40  ;;  %v345_v19 = vperm.slane %v1324_v3, 0 }
 0x1eb   :  { %v496_v33 = vsel %vm493_vm6, %v1415_v48, %v488_v7  ;;  %v533_v52 = vsel %vm532_vm4, %v529_v55, %v1361_v15  ;;  %v534_v22 = vsel %vm532_vm4, %v527_v34, %v529_v55  ;;  %v495_v23 = vsel %vm493_vm6, %v488_v7, %v1433_v62  ;;  %v619_v55 = vld.sshfl [vmem:[#allocation1 + $0x8] sm:$0xff pattern:$0x75316420] }
 0x1ec   :  { %v509_v9 = vmul.f32 %v501_v32, %v496_v33  ;;  %v549_v48 = vmul.f32 %v541_v20, %v534_v22  ;;  %v550_v15 = vmul.f32 %v542_v21, %v533_v52  ;;  %v511_v34 = vmul.f32 %v503_v17, %v494_v38  ;;  %v620_v33 = vld.sshfl [vmem:[#allocation1 + $0x10] sm:$0xff pattern:$0x75316420]  ;;  %v408_v52 = vpop.permute.xlu2 %407 }
 0x1ed   :  { %v510_v28 = vmul.f32 %v502_v39, %v495_v23  ;;  %v659_v22 = vsel %vm70_vm0, %v619_v55, %v631_v8  ;;  %v660_v18 = vsel %vm70_vm0, %v620_v33, %v632_v24  ;;  %v423_v8 = vperm.slane %v1342_v10, 0 }
 0x1ee   :  { %747 = vmatpush.bf16.msra.mxu3 %v674_v2  ;;  %v662_v62 = vsel %vm70_vm0, %v509_v9, %v642_v51  ;;  %v643_v5 = vrot.slane %v549_v48, 4  ;;  %v644_v47 = vrot.slane %v550_v15, 4  ;;  %v346_v51 = vperm.slane %v1324_v3, 1  ;;  %v666_v48 = vld [vmem:[%s1896_s7] sm:$0x3] }
 0x1ef   :  { %v671_v7 = vpack.c.bf16 %v662_v62, %v658_v61  ;;  %v424_v24 = vperm.slane %v1342_v10, 1  ;;  %v418_v42 = vsel %vm415_vm1, %v408_v52, %v1315_v63  ;;  %v306_v62 = vperm.slane %v1347_v11, 0 }
 0x1f0   :  { %v663_v38 = vsel %vm70_vm0, %v510_v28, %v643_v5  ;;  %v664_v40 = vsel %vm70_vm0, %v511_v34, %v644_v47  ;;  %v384_v28 = vperm.slane %v1354_v12, 0  ;;  %v385_v5 = vperm.slane %v1354_v12, 1 }
 0x1f1   :  { %708 = vmatpush.bf16.msra.mxu0 %v671_v7  ;;  %v672_v9 = vpack.c.bf16 %v663_v38, %v659_v22  ;;  %v673_v2 = vpack.c.bf16 %v664_v40, %v660_v18  ;;  %v432_v63 = vmul.f32 %v424_v24, %v418_v42 }
 0x1f2   :  { %748 = vmatpush.bf16.msra.mxu3 %v670_v45  ;;  %v330_v23 = vpop.permute.xlu1 %329  ;;  %v419_v45 = vsel %vm415_vm1, %v1307_v58, %v408_v52  ;;  %v290_v34 = vpop.permute.xlu0 %289  ;;  %v307_v58 = vperm.slane %v1347_v11, 1 }
 0x1f3   :  { %v340_v15 = vsel %vm337_vm13, %v330_v23, %v1305_v57  ;;  %v341_v41 = vsel %vm337_vm13, %v1301_v54, %v330_v23  ;;  %721 = vmatpush.bf16.msra.mxu1 %v672_v9  ;;  %734 = vmatpush.bf16.msra.mxu2 %v673_v2  ;;  %v431_v54 = vmul.f32 %v423_v8, %v419_v45  ;;  %v608_v38 = vrot.slane %v432_v63, 4  ;;  %v201_v45 = vpop.f32.mrf.mxu0 }
 0x1f4   :  { %v353_v57 = vmul.f32 %v345_v19, %v341_v41  ;;  %v354_v61 = vmul.f32 %v346_v51, %v340_v15  ;;  %v302_v47 = vsel %vm299_vm14, %v290_v34, %v1303_v56  ;;  %v303_v7 = vsel %vm299_vm14, %v1309_v59, %v290_v34  ;;  %v243_v15 = vpop.f32.mrf.mxu3  ;;  %v229_v41 = vpop.f32.mrf.mxu2 }
 0x1f5   :  { %1110 = vmatmul.msk.bf16.vlgmr.msra.gmra.mxu3 %vm685_vm7, %v666_v48  ;;  %v607_v22 = vrot.slane %v431_v54, 4  ;;  %v314_v59 = vmul.f32 %v306_v62, %v303_v7  ;;  %v315_v43 = vmul.f32 %v307_v58, %v302_v47  ;;  %v215_v34 = vpop.f32.mrf.mxu1 }
 0x1f6   :  { %v595_v55 = vrot.slane %v353_v57, 4  ;;  %v596_v33 = vrot.slane %v354_v61, 4  ;;  %v179_v57 = vpop.permute.xlu2 %178 }
 0x1f7   :  { %735 = vmatpush.bf16.msra.mxu2 %v669_v46  ;;  %v202_v63 = vadd.f32 %v201_v45, %v179_v57  ;;  %v216_v47 = vadd.f32 %v215_v34, %v179_v57 }
 0x1fa   :  { %v369_v52 = vpop.permute.xlu1 %368  ;;  %1109 = vmatmul.msk.bf16.vlgmr.msra.gmra.mxu2 %vm685_vm7, %v666_v48  ;;  %v683_v54 = vpop.permute.xlu0 %682 }
 0x1fb   :  { %v379_v18 = vsel %vm376_vm15, %v369_v52, %v1311_v60  ;;  %v380_v56 = vsel %vm376_vm15, %v1327_v4, %v369_v52  ;;  %v650_v60 = vsel %vm70_vm0, %v314_v59, %v595_v55  ;;  %v651_v4 = vsel %vm70_vm0, %v315_v43, %v596_v33 }
 0x1fc   :  { %v392_v44 = vmul.f32 %v384_v28, %v380_v56  ;;  %v393_v46 = vmul.f32 %v385_v5, %v379_v18  ;;  %v762_v56 = vrot.slane %v202_v63, 4  ;;  %v244_v43 = vadd.f32 %v243_v15, %v179_v57 }
 0x1fe   :  { %v654_v40 = vsel %vm70_vm0, %v392_v44, %v607_v22  ;;  %v655_v23 = vsel %vm70_vm0, %v393_v46, %v608_v38 }
 0x1ff   :  { %v667_v9 = vpack.c.bf16 %v654_v40, %v650_v60  ;;  %v668_v2 = vpack.c.bf16 %v655_v23, %v651_v4  ;;  %v765_v23 = vrot.slane %v244_v43, 4 }
 0x201   :  { %709 = vmatpush.bf16.msra.mxu0 %v667_v9  ;;  %722 = vmatpush.bf16.msra.mxu1 %v668_v2 }
 0x204   :  { %1107 = vmatmul.msk.bf16.vlgmr.msra.gmra.mxu0 %vm685_vm7, %v666_v48  ;;  %1108 = vmatmul.msk.bf16.vlgmr.msra.gmra.mxu1 %vm685_vm7, %v666_v48  ;;  %v763_v48 = vrot.slane %v216_v47, 4 }
 0x278   :  { %v750_v42 = vpop.f32.mrf.mxu3 }
 0x279   :  { %v751_v38 = vadd.f32 %v750_v42, %v683_v54 }
 0x27b   :  { %v757_v60 = vmul.f32 %v751_v38, %v244_v43 }
 0x27d   :  { %v737_v61 = vpop.f32.mrf.mxu2 }
 0x280   :  { %v752_v7 = vpop.f32.mrf.mxu3 }
 0x281   :  { %v711_v55 = vpop.f32.mrf.mxu0  ;;  %v724_v33 = vpop.f32.mrf.mxu1  ;;  %v773_v7 = vadd.f32 %v765_v23, %v757_v60 }
 0x282   :  { %v712_v52 = vadd.f32 %v711_v55, %v683_v54  ;;  %v725_v22 = vadd.f32 %v724_v33, %v683_v54  ;;  %v230_v55 = vadd.f32 %v229_v41, %v179_v57  ;;  %v1112_v41 = vld [vmem:[%s1894_s8 + $0x4] sm:$0xf] }
 0x283   :  { %v781_v15 = vmul.f32 0.01, %v773_v7  ;;  %vm777_vm10 = vcmp.ge.f32.partialorder %v773_v7, 0.0 }
 0x284   :  { %v754_v18 = vmul.f32 %v712_v52, %v202_v63  ;;  %v755_v59 = vmul.f32 %v725_v22, %v216_v47  ;;  %v738_v47 = vadd.f32 %v737_v61, %v683_v54  ;;  %v764_v52 = vrot.slane %v230_v55, 4 }
 0x285   :  { %v739_v40 = vpop.f32.mrf.mxu2  ;;  %v1622_v63 = vsel %vm777_vm10, %v773_v7, %v781_v15 }
 0x286   :  { %v770_v44 = vadd.f32 %v762_v56, %v754_v18  ;;  %v771_v46 = vadd.f32 %v763_v48, %v755_v59  ;;  %v756_v33 = vmul.f32 %v738_v47, %v230_v55 }
 0x288   :  { %vm774_vm8 = vcmp.ge.f32.partialorder %v770_v44, 0.0  ;;  %v778_v4 = vmul.f32 0.01, %v770_v44  ;;  %vm775_vm9 = vcmp.ge.f32.partialorder %v771_v46, 0.0  ;;  %v779_v9 = vmul.f32 0.01, %v771_v46 }
 0x289   :  { %v713_v2 = vpop.f32.mrf.mxu0  ;;  %v726_v45 = vpop.f32.mrf.mxu1  ;;  %v772_v22 = vadd.f32 %v764_v52, %v756_v33 }
 0x28a   :  { %v1612_v34 = vsel %vm774_vm8, %v770_v44, %v778_v4  ;;  %v1614_v42 = vsel %vm775_vm9, %v771_v46, %v779_v9 }
 0x28b   :  { %802 = vrot.lane.b32.xlu2 %v1612_v34, %s1135_s24  ;;  %898 = vrot.lane.b32.xlu1 %v1612_v34, %s1141_s30  ;;  %v780_v61 = vmul.f32 0.01, %v772_v22  ;;  %vm776_vm11 = vcmp.ge.f32.partialorder %v772_v22, 0.0 }
 0x28c   :  { %884 = vrot.lane.b32.xlu0 %v1614_v42, %s1140_s29 }
 0x28d   :  { %v1642_v54 = vsel %vm776_vm11, %v772_v22, %v780_v61 }
 0x293   :  { %788 = vrot.lane.b32.xlu2 %v1614_v42, %s1134_s23  ;;  %850 = vrot.lane.b32.xlu1 %v1612_v34, %s1138_s27 }
 0x294   :  { %904 = vrot.lane.b32.xlu0 %v1622_v63, %s1141_s30 }
 0x29b   :  { %820 = vrot.lane.b32.xlu2 %v1614_v42, %s1136_s25  ;;  %882 = vrot.lane.b32.xlu1 %v1612_v34, %s1140_s29 }
 0x29c   :  { %856 = vrot.lane.b32.xlu0 %v1622_v63, %s1138_s27 }
 0x2a3   :  { %852 = vrot.lane.b32.xlu2 %v1614_v42, %s1138_s27  ;;  %866 = vrot.lane.b32.xlu1 %v1612_v34, %s1139_s28 }
 0x2a4   :  { %888 = vrot.lane.b32.xlu0 %v1622_v63, %s1140_s29 }
 0x2ab   :  { %902 = vrot.lane.b32.xlu2 %v1642_v54, %s1141_s30  ;;  %804 = vrot.lane.b32.xlu1 %v1614_v42, %s1135_s24 }
 0x2ac   :  { %872 = vrot.lane.b32.xlu0 %v1622_v63, %s1139_s28 }
 0x2b3   :  { %854 = vrot.lane.b32.xlu2 %v1642_v54, %s1138_s27  ;;  %836 = vrot.lane.b32.xlu1 %v1614_v42, %s1137_s26 }
 0x2b4   :  { %808 = vrot.lane.b32.xlu0 %v1622_v63, %s1135_s24 }
 0x2bb   :  { %886 = vrot.lane.b32.xlu2 %v1642_v54, %s1140_s29  ;;  %900 = vrot.lane.b32.xlu1 %v1614_v42, %s1141_s30 }
 0x2bc   :  { %840 = vrot.lane.b32.xlu0 %v1622_v63, %s1137_s26 }
 0x2c3   :  { %870 = vrot.lane.b32.xlu2 %v1642_v54, %s1139_s28  ;;  %868 = vrot.lane.b32.xlu1 %v1614_v42, %s1139_s28 }
 0x2c4   :  { %790 = vrot.lane.b32.xlu0 %v1642_v54, %s1134_s23 }
 0x2cb   :  { %806 = vrot.lane.b32.xlu2 %v1642_v54, %s1135_s24  ;;  %792 = vrot.lane.b32.xlu1 %v1622_v63, %s1134_s23 }
 0x2cc   :  { %822 = vrot.lane.b32.xlu0 %v1642_v54, %s1136_s25 }
 0x2d3   :  { %838 = vrot.lane.b32.xlu2 %v1642_v54, %s1137_s26  ;;  %824 = vrot.lane.b32.xlu1 %v1622_v63, %s1136_s25 }
 0x2d4   :  { %834 = vrot.lane.b32.xlu0 %v1612_v34, %s1137_s26 }
 0x2db   :  { %818 = vrot.lane.b32.xlu2 %v1612_v34, %s1136_s25  ;;  %786 = vrot.lane.b32.xlu1 %v1612_v34, %s1134_s23 }
 0x2dc   :  { %996 = vperm.xlu0 %1128, %v1112_v41  }
 0x2e5   :  { %v1687_v57 = vpop.permute.xlu2 %802 }
 0x2ed   :  { %v1689_v38 = vpop.permute.xlu2 %788 }
 0x2f5   :  { %v1691_v18 = vpop.permute.xlu2 %820 }
 0x2fd   :  { %v853_v56 = vpop.permute.xlu2 %852  ;;  %v899_v59 = vpop.permute.xlu1 %898 }
 0x2fe   :  { %v885_v48 = vpop.permute.xlu0 %884 }
 0x305   :  { %v903_v43 = vpop.permute.xlu2 %902  ;;  %v851_v44 = vpop.permute.xlu1 %850 }
 0x306   :  { %v905_v46 = vpop.permute.xlu0 %904 }
 0x307   :  { %v909_v60 = vsel %vm571_vm2, %v905_v46, %v899_v59  ;;  %v906_v40 = vsel %vm571_vm2, %v903_v43, %v905_v46 }
 0x308   :  { %v913_v4 = vmul.f32 %v909_v60, %v582_v31  ;;  %v912_v23 = vmul.f32 %v906_v40, %v581_v50 }
 0x30a   :  { %v991_v9 = vpack.c.bf16 %v913_v4, %v913_v4  ;;  %v990_v2 = vpack.c.bf16 %v912_v23, %v912_v23 }
 0x30c   :  { %v1009_v45 = vsel %vm689_vm5, %v990_v2, 0  ;;  %v1012_v7 = vsel %vm689_vm5, %v991_v9, 0 }
 0x30d   :  { %1045 = vmatpush.bf16.msrb.mxu2 %v1009_v45  ;;  %1058 = vmatpush.bf16.msrb.mxu3 %v1012_v7  ;;  %v855_v15 = vpop.permute.xlu2 %854  ;;  %v883_v47 = vpop.permute.xlu1 %882 }
 0x30e   :  { %v857_v55 = vpop.permute.xlu0 %856 }
 0x30f   :  { %v861_v31 = vsel %vm454_vm3, %v857_v55, %v851_v44  ;;  %v858_v50 = vsel %vm454_vm3, %v855_v15, %v857_v55 }
 0x310   :  { %v865_v46 = vmul.f32 %v861_v31, %v465_v13  ;;  %v864_v60 = vmul.f32 %v858_v50, %v464_v36 }
 0x312   :  { %v945_v2 = vrot.slane %v865_v46, 4  ;;  %v944_v45 = vrot.slane %v864_v60, 4 }
 0x314   :  { %v972_v31 = vsel %vm70_vm0, %v1642_v54, %v944_v45  ;;  %v859_v54 = vsel %vm454_vm3, %v853_v56, %v855_v15  ;;  %v892_v15 = vsel %vm532_vm4, %v883_v47, %v885_v48 }
 0x315   :  { %v887_v33 = vpop.permute.xlu2 %886  ;;  %v867_v52 = vpop.permute.xlu1 %866 }
 0x316   :  { %v889_v22 = vpop.permute.xlu0 %888 }
 0x317   :  { %v893_v61 = vsel %vm532_vm4, %v889_v22, %v883_v47  ;;  %v890_v41 = vsel %vm532_vm4, %v887_v33, %v889_v22 }
 0x318   :  { %v897_v40 = vmul.f32 %v893_v61, %v543_v14  ;;  %v896_v4 = vmul.f32 %v890_v41, %v542_v21  ;;  %v973_v61 = vsel %vm70_vm0, %v1622_v63, %v945_v2 }
 0x31a   :  { %v957_v22 = vrot.slane %v897_v40, 4  ;;  %v956_v36 = vrot.slane %v896_v4, 4 }
 0x31d   :  { %v871_v23 = vpop.permute.xlu2 %870  ;;  %v1719_v9 = vpop.permute.xlu1 %804 }
 0x31e   :  { %v873_v7 = vpop.permute.xlu0 %872 }
 0x31f   :  { %v877_v55 = vsel %vm493_vm6, %v873_v7, %v867_v52  ;;  %v874_v13 = vsel %vm493_vm6, %v871_v23, %v873_v7 }
 0x320   :  { %v881_v14 = vmul.f32 %v877_v55, %v504_v25  ;;  %v880_v21 = vmul.f32 %v874_v13, %v503_v17  ;;  %v860_v17 = vsel %vm454_vm3, %v851_v44, %v853_v56  ;;  %v863_v56 = vmul.f32 %v859_v54, %v463_v35 }
 0x321   :  { %v862_v44 = vmul.f32 %v860_v17, %v462_v26 }
 0x322   :  { %v976_v50 = vsel %vm70_vm0, %v880_v21, %v956_v36  ;;  %v977_v41 = vsel %vm70_vm0, %v881_v14, %v957_v22  ;;  %v943_v35 = vrot.slane %v863_v56, 4 }
 0x323   :  { %v986_v46 = vpack.c.bf16 %v976_v50, %v972_v31  ;;  %v987_v60 = vpack.c.bf16 %v977_v41, %v973_v61  ;;  %v942_v53 = vrot.slane %v862_v44, 4  ;;  %v1906_v44 = vperm.slane %v1324_v3, 3 }
 0x324   :  { %v971_v50 = vsel %vm70_vm0, %v1614_v42, %v943_v35  ;;  %v812_v35 = vsel %vm337_vm13, %v1687_v57, %v1719_v9 }
 0x325   :  { %1046 = vmatpush.bf16.msrb.mxu2 %v986_v46  ;;  %1059 = vmatpush.bf16.msrb.mxu3 %v987_v60  ;;  %v1735_v40 = vpop.permute.xlu1 %836  ;;  %v807_v4 = vpop.permute.xlu2 %806  ;;  %v970_v31 = vsel %vm70_vm0, %v1612_v34, %v942_v53  ;;  %v1904_v60 = vperm.slane %v1347_v11, 2  ;;  %v1111_v53 = vld [vmem:[%s1896_s7 + $0x2] sm:$0x3] }
 0x326   :  { %v1737_v25 = vpop.permute.xlu0 %808 }
 0x32d   :  { %v901_v45 = vpop.permute.xlu1 %900  ;;  %v839_v36 = vpop.permute.xlu2 %838 }
 0x32e   :  { %v1743_v7 = vpop.permute.xlu0 %840  ;;  %v907_v63 = vsel %vm571_vm2, %v901_v45, %v903_v43  ;;  %v908_v2 = vsel %vm571_vm2, %v899_v59, %v901_v45  ;;  %v891_v43 = vsel %vm532_vm4, %v885_v48, %v887_v33  ;;  %v810_v45 = vsel %vm337_vm13, %v807_v4, %v1737_v25 }
 0x32f   :  { %v910_v55 = vmul.f32 %v908_v2, %v579_v30  ;;  %v911_v13 = vmul.f32 %v907_v63, %v580_v29  ;;  %v894_v30 = vmul.f32 %v892_v15, %v540_v37  ;;  %v895_v49 = vmul.f32 %v891_v43, %v541_v20 }
 0x330   :  { %v817_v56 = vmul.f32 %v810_v45, %v1906_v44 }
 0x331   :  { %v988_v22 = vpack.c.bf16 %v910_v55, %v910_v55  ;;  %v989_v59 = vpack.c.bf16 %v911_v13, %v911_v13  ;;  %v954_v33 = vrot.slane %v894_v30, 4  ;;  %v955_v0 = vrot.slane %v895_v49, 4 }
 0x332   :  { %v1905_v55 = vperm.slane %v1354_v12, 2  ;;  %v1908_v49 = vperm.slane %v1347_v11, 3 }
 0x333   :  { %v1003_v29 = vsel %vm689_vm5, %v988_v22, 0  ;;  %v1006_v26 = vsel %vm689_vm5, %v989_v59, 0  ;;  %v1907_v22 = vperm.slane %v1342_v10, 3 }
 0x334   :  { %1019 = vmatpush.bf16.msrb.mxu0 %v1003_v29  ;;  %1032 = vmatpush.bf16.msrb.mxu1 %v1006_v26 }
 0x335   :  { %v869_v47 = vpop.permute.xlu1 %868 }
 0x336   :  { %v791_v14 = vpop.permute.xlu0 %790  ;;  %v875_v48 = vsel %vm493_vm6, %v869_v47, %v871_v23  ;;  %v876_v37 = vsel %vm493_vm6, %v867_v52, %v869_v47  ;;  %v811_v23 = vsel %vm337_vm13, %v1719_v9, %v807_v4  ;;  %v843_v52 = vsel %vm415_vm1, %v1735_v40, %v839_v36 }
 0x337   :  { %v878_v20 = vmul.f32 %v876_v37, %v501_v32  ;;  %v879_v21 = vmul.f32 %v875_v48, %v502_v39  ;;  %v795_v34 = vsel %vm299_vm14, %v1689_v38, %v791_v14  ;;  %v816_v42 = vmul.f32 %v811_v23, %v347_v6 }
 0x338   :  { %v848_v41 = vmul.f32 %v843_v52, %v425_v16  ;;  %v800_v17 = vmul.f32 %v795_v34, %v1904_v60  ;;  %v842_v6 = vsel %vm415_vm1, %v839_v36, %v1743_v7  ;;  %v813_v47 = vsel %vm337_vm13, %v1737_v25, %v1687_v57  ;;  %v819_v57 = vpop.permute.xlu2 %818 }
 0x339   :  { %v974_v61 = vsel %vm70_vm0, %v878_v20, %v954_v33  ;;  %v975_v32 = vsel %vm70_vm0, %v879_v21, %v955_v0  ;;  %v920_v2 = vrot.slane %v816_v42, 4  ;;  %v849_v59 = vmul.f32 %v842_v6, %v1907_v22 }
 0x33a   :  { %v984_v27 = vpack.c.bf16 %v974_v61, %v970_v31  ;;  %v985_v39 = vpack.c.bf16 %v975_v32, %v971_v50  ;;  %v932_v16 = vrot.slane %v848_v41, 4  ;;  %v921_v36 = vrot.slane %v817_v56, 4  ;;  %v1132_v56 = vld [vmem:[%s1893_s0] sm:$0xff] }
 0x33b   :  { %v964_v4 = vsel %vm70_vm0, %v800_v17, %v920_v2  ;;  %v933_v37 = vrot.slane %v849_v59, 4  ;;  %v1909_v9 = vperm.slane %v1354_v12, 3  ;;  %v815_v50 = vmul.f32 %v812_v35, %v346_v51 }
 0x33c   :  { %1020 = vmatpush.bf16.msrb.mxu0 %v984_v27  ;;  %1033 = vmatpush.bf16.msrb.mxu1 %v985_v39  ;;  %v828_v52 = vsel %vm376_vm15, %v819_v57, %v1691_v18 }
 0x33d   :  { %v793_v46 = vpop.permute.xlu1 %792  ;;  %v919_v32 = vrot.slane %v815_v50, 4 }
 0x33e   :  { %v823_v54 = vpop.permute.xlu0 %822  ;;  %v794_v15 = vsel %vm299_vm14, %v791_v14, %v793_v46 }
 0x33f   :  { %v827_v63 = vsel %vm376_vm15, %v1691_v18, %v823_v54  ;;  %v801_v29 = vmul.f32 %v794_v15, %v1908_v49 }
 0x340   :  { %v832_v13 = vmul.f32 %v827_v63, %v1905_v55  ;;  %v1131_v55 = vld [vmem:[%s1893_s0 + $0x8] sm:$0xff] }
 0x341   :  { %v965_v31 = vsel %vm70_vm0, %v801_v29, %v921_v36 }
 0x342   :  { %v968_v43 = vsel %vm70_vm0, %v832_v13, %v932_v16 }
 0x343   :  { %v982_v30 = vpack.c.bf16 %v968_v43, %v964_v4 }
 0x345   :  { %1047 = vmatpush.bf16.msrb.mxu2 %v982_v30  ;;  %v825_v26 = vpop.permute.xlu1 %824 }
 0x346   :  { %v835_v14 = vpop.permute.xlu0 %834  ;;  %v826_v48 = vsel %vm376_vm15, %v823_v54, %v825_v26 }
 0x347   :  { %v844_v33 = vsel %vm415_vm1, %v835_v14, %v1735_v40  ;;  %v845_v0 = vsel %vm415_vm1, %v1743_v7, %v835_v14  ;;  %v833_v20 = vmul.f32 %v826_v48, %v1909_v9  ;;  %v814_v7 = vmul.f32 %v813_v47, %v345_v19 }
 0x348   :  { %1115 = vmatmul.msk.bf16.vlgmr.msrb.gmra.mxu2 %vm685_vm7, %v1111_v53  ;;  %v846_v25 = vmul.f32 %v845_v0, %v423_v8  ;;  %v847_v21 = vmul.f32 %v844_v33, %v424_v24  ;;  %v829_v8 = vsel %vm376_vm15, %v825_v26, %v819_v57  ;;  %v831_v19 = vmul.f32 %v828_v52, %v385_v5 }
 0x349   :  { %v969_v40 = vsel %vm70_vm0, %v833_v20, %v933_v37  ;;  %v918_v27 = vrot.slane %v814_v7, 4  ;;  %v830_v18 = vmul.f32 %v829_v8, %v384_v28 }
 0x34a   :  { %v983_v23 = vpack.c.bf16 %v969_v40, %v965_v31  ;;  %v930_v10 = vrot.slane %v846_v25, 4  ;;  %v931_v24 = vrot.slane %v847_v21, 4 }
 0x34c   :  { %1060 = vmatpush.bf16.msrb.mxu3 %v983_v23  ;;  %v967_v41 = vsel %vm70_vm0, %v831_v19, %v931_v24 }
 0x34d   :  { %v787_v61 = vpop.permute.xlu1 %786 }
 0x34e   :  { %v796_v51 = vsel %vm299_vm14, %v787_v61, %v1689_v38  ;;  %v797_v3 = vsel %vm299_vm14, %v793_v46, %v787_v61  ;;  %v966_v38 = vsel %vm70_vm0, %v830_v18, %v930_v10  ;;  %v997_v12 = vpop.permute.xlu0 %996 }
 0x34f   :  { %v798_v39 = vmul.f32 %v797_v3, %v306_v62  ;;  %v799_v34 = vmul.f32 %v796_v51, %v307_v58  ;;  %1116 = vmatmul.msk.bf16.vlgmr.msrb.gmra.mxu3 %vm685_vm7, %v1111_v53 }
 0x351   :  { %v962_v42 = vsel %vm70_vm0, %v798_v39, %v918_v27  ;;  %v963_v1 = vsel %vm70_vm0, %v799_v34, %v919_v32 }
 0x352   :  { %v980_v5 = vpack.c.bf16 %v966_v38, %v962_v42  ;;  %v981_v46 = vpack.c.bf16 %v967_v41, %v963_v1 }
 0x354   :  { %1021 = vmatpush.bf16.msrb.mxu0 %v980_v5  ;;  %1034 = vmatpush.bf16.msrb.mxu1 %v981_v46 }
 0x357   :  { %1113 = vmatmul.msk.bf16.vlgmr.msrb.gmra.mxu0 %vm685_vm7, %v1111_v53  ;;  %1114 = vmatmul.msk.bf16.vlgmr.msrb.gmra.mxu1 %vm685_vm7, %v1111_v53 }
 0x3cb   :  { %v1049_v11 = vpop.f32.mrf.mxu2 }
 0x3cc   :  { %v1050_v54 = vadd.f32 %v1049_v11, %v997_v12 }
 0x3d2   :  { %v1062_v62 = vpop.f32.mrf.mxu3 }
 0x3d3   :  { %v1063_v58 = vadd.f32 %v1062_v62, %v997_v12  ;;  %v1051_v28 = vpop.f32.mrf.mxu2 }
 0x3d4   :  { %v1023_v60 = vpop.f32.mrf.mxu0  ;;  %v1036_v17 = vpop.f32.mrf.mxu1 }
 0x3d5   :  { %v1071_v45 = vrot.slane %v1063_v58, 4  ;;  %v1037_v63 = vadd.f32 %v1036_v17, %v997_v12  ;;  %v1024_v6 = vadd.f32 %v1023_v60, %v997_v12 }
 0x3d7   :  { %v1073_v2 = vsel %vm70_vm0, %v1050_v54, %v1071_v45  ;;  %v1070_v16 = vrot.slane %v1037_v63, 4 }
 0x3d8   :  { %v1077_v13 = vadd.f32 %v1131_v55, %v1073_v2 }
 0x3d9   :  { %v1072_v44 = vsel %vm70_vm0, %v1024_v6, %v1070_v16 }
 0x3da   :  { %1079 = vst [vmem:[%s1897_s9 + $0x8] sm:$0xff] %v1077_v13  ;;  %v1076_v15 = vadd.f32 %v1132_v56, %v1072_v44  ;;  %v1064_v4 = vpop.f32.mrf.mxu3 }
 0x3dc   :  { %1078 = vst [vmem:[%s1897_s9] sm:$0xff] %v1076_v15  ;;  %v1025_v43 = vpop.f32.mrf.mxu0  ;;  %v1038_v22 = vpop.f32.mrf.mxu1 }

</bundles_post_ra>
